<compile_context>
chip_gen: v7x
topology: tpu7x:2x2x1
jax: 0.10.0
libtpu: 0.0.40
codegen_flags: <defaults>
</compile_context>

<pallas_src>
import functools

import jax
import jax.numpy as jnp
import numpy as np
from jax.experimental import pallas as pl
from jax.experimental.pallas import tpu as pltpu


def _round_up(x, m):
    return ((x + m - 1) // m) * m


def _qflv2_elementwise(p, g, is_pos, beta):
    """Elementwise QFLv2 loss. is_pos=None -> QFL degenerate path (all positive)."""
    p = p.astype(jnp.float32)
    g = g.astype(jnp.float32)
    # torch.nn.functional.binary_cross_entropy clamps each log term at -100.
    log_p = jnp.maximum(jnp.log(p), -100.0)
    log_1mp = jnp.maximum(jnp.log(1.0 - p), -100.0)
    bce_zero = -log_1mp                               # BCE(p, 0)
    bce_gt = -(g * log_p + (1.0 - g) * log_1mp)       # BCE(p, g)

    if float(beta) == 2.0:
        # Exact for negative bases (gt - pred can be < 0); default path.
        pow_ = lambda x: x * x
    else:
        # Matches torch: NaN for negative base with non-integral exponent.
        pow_ = lambda x: jnp.power(x, beta)

    pos = bce_gt * pow_(g - p)
    if is_pos is None:
        return pos
    neg = bce_zero * pow_(p)
    return jnp.where(is_pos, pos, neg)


def _qflv2_kernel_weighted(pred_ref, gt_ref, w_ref, out_ref, *, beta):
    loss = _qflv2_elementwise(pred_ref[...], gt_ref[...], w_ref[...] != 0, beta)
    c = loss.shape[-1]
    # Column partial sum only (no cross-lane reduce, no SMEM scalar RMW).
    out_ref[...] = jnp.sum(loss, axis=0, keepdims=True).reshape(1, 1, c)


def _qflv2_kernel_noweight(pred_ref, gt_ref, out_ref, *, beta):
    loss = _qflv2_elementwise(pred_ref[...], gt_ref[...], None, beta)
    c = loss.shape[-1]
    out_ref[...] = jnp.sum(loss, axis=0, keepdims=True).reshape(1, 1, c)


def qflv2_loss(pred_logits, gt_logits, weight=None, use_weight=True,
               beta=2.0, reduction='mean', tile_n=1024):
    """Pallas implementation of QFLv2.forward (scalar loss for mean/sum).

    pred_logits / gt_logits: [N, C] probabilities (post-sigmoid), f32 or bf16.
    weight: [N, C] positive-sample mask (bool / integer); required if use_weight.
    """
    # TODO(synk): reduction='none' (elementwise [N, C] output) not implemented;
    # only 'mean' and 'sum' are supported, matching the common training usage.
    n, c = pred_logits.shape
    assert reduction in ('mean', 'sum')

    # ---- tile-size choice (v7x-aware VMEM budget) --------------------------
    # Cap each f32-equivalent input tile at ~4 MiB so that
    # 3 inputs x 2 pipeline buffers stays well under the 32 MiB default scoped
    # VMEM (64 MiB physical on v7x), while keeping per-step DMAs large enough
    # to amortize the ~0.35 us grid-step overhead.
    max_rows = max(32, (4 * 1024 * 1024) // (c * 4))
    tn = max(32, min(int(tile_n), max_rows))
    tn = _round_up(min(tn, n), 32)          # multiple of 32 (int8 mask sublane tiling)
    n_pad = _round_up(n, tn)
    num_blocks = n_pad // tn

    # ---- pad rows: zero pred/gt/weight rows contribute exactly zero loss ---
    pred = pred_logits
    gt = gt_logits
    if n_pad != n:
        row_pad = ((0, n_pad - n), (0, 0))
        pred = jnp.pad(pred, row_pad)
        gt = jnp.pad(gt, row_pad)

    in_spec = pl.BlockSpec((tn, c), lambda i: (i, 0))
    out_spec = pl.BlockSpec((1, 1, c), lambda i: (i, 0, 0))
    out_shape = jax.ShapeDtypeStruct((num_blocks, 1, c), jnp.float32)
    cparams = pltpu.CompilerParams(dimension_semantics=("parallel",))

    if use_weight:
        assert weight is not None, "use_weight=True requires a weight mask"
        # Ship the mask at 1 byte/elem (int8), never as f32.
        w = weight if weight.dtype == jnp.int8 else (weight != 0).astype(jnp.int8)
        if n_pad != n:
            w = jnp.pad(w, ((0, n_pad - n), (0, 0)))
        partials = pl.pallas_call(
            functools.partial(_qflv2_kernel_weighted, beta=beta),
            out_shape=out_shape,
            grid_spec=pltpu.PrefetchScalarGridSpec(
                num_scalar_prefetch=0,
                grid=(num_blocks,),
                in_specs=[in_spec, in_spec, in_spec],
                out_specs=out_spec,
            ),
            compiler_params=cparams,
        )(pred, gt, w)
    else:
        # QFL degenerate path: 2-input kernel, no ones-mask DMA at all.
        partials = pl.pallas_call(
            functools.partial(_qflv2_kernel_noweight, beta=beta),
            out_shape=out_shape,
            grid_spec=pltpu.PrefetchScalarGridSpec(
                num_scalar_prefetch=0,
                grid=(num_blocks,),
                in_specs=[in_spec, in_spec],
                out_specs=out_spec,
            ),
            compiler_params=cparams,
        )(pred, gt)

    # Final (tiny) cross-lane / cross-block reduction + mean/sum epilogue in XLA.
    total = jnp.sum(partials, dtype=jnp.float32)
    if reduction == 'mean':
        return total / jnp.float32(n * c)
    return total


def qflv2_loss_ref(pred, gt, weight, use_weight=True, beta=2.0, reduction='mean'):
    """Pure-JAX reference mirroring the PyTorch module."""
    p = pred.astype(jnp.float32)
    g = gt.astype(jnp.float32)
    log_p = jnp.maximum(jnp.log(p), -100.0)
    log_1mp = jnp.maximum(jnp.log(1.0 - p), -100.0)
    bce0 = -log_1mp
    bceg = -(g * log_p + (1.0 - g) * log_1mp)
    pow_ = (lambda x: x * x) if float(beta) == 2.0 else (lambda x: jnp.power(x, beta))
    neg = bce0 * pow_(p)
    pos = bceg * pow_(g - p)
    loss = jnp.where(weight, pos, neg) if use_weight else pos
    return loss.mean() if reduction == 'mean' else loss.sum()


if __name__ == "__main__":
    # Module has no learnable parameters; only inputs are needed.
    key = jax.random.PRNGKey(0)
    k1, k2, k3 = jax.random.split(key, 3)

    N, C = 256, 128  # samples x classes (lane-aligned)
    pred_logits = jax.nn.sigmoid(jax.random.normal(k1, (N, C), jnp.float32))
    gt_logits = jax.nn.sigmoid(jax.random.normal(k2, (N, C), jnp.float32))
    weight = jax.random.bernoulli(k3, p=0.25, shape=(N, C))  # bool positive mask

    # 1) Weighted QFLv2, mean reduction.
    loss = jax.block_until_ready(
        qflv2_loss(pred_logits, gt_logits, weight,
                   use_weight=True, beta=2.0, reduction='mean'))
    ref = qflv2_loss_ref(pred_logits, gt_logits, weight, True, 2.0, 'mean')
    np.testing.assert_allclose(np.asarray(loss), np.asarray(ref),
                               rtol=3e-5, atol=1e-6)

    # 2) use_weight=False (QFL degenerate) path, sum reduction (2-input kernel).
    loss2 = jax.block_until_ready(
        qflv2_loss(pred_logits, gt_logits, None,
                   use_weight=False, beta=2.0, reduction='sum'))
    ref2 = qflv2_loss_ref(pred_logits, gt_logits, None, False, 2.0, 'sum')
    np.testing.assert_allclose(np.asarray(loss2), np.asarray(ref2),
                               rtol=3e-5, atol=1e-3)

    # 3) Non-multiple N exercises the zero-padding path (padded rows add 0 loss).
    Np = 200
    loss3 = jax.block_until_ready(
        qflv2_loss(pred_logits[:Np], gt_logits[:Np], weight[:Np],
                   use_weight=True, beta=2.0, reduction='sum'))
    ref3 = qflv2_loss_ref(pred_logits[:Np], gt_logits[:Np], weight[:Np],
                          True, 2.0, 'sum')
    np.testing.assert_allclose(np.asarray(loss3), np.asarray(ref3),
                               rtol=3e-5, atol=1e-3)

    print("KERNEL_OK")
</pallas_src>

<mosaic_0001>
module attributes {stable_mosaic.version = 11 : i64} {
  func.func @_qflv2_kernel_weighted(%arg0: i32, %arg1: memref<256x128xf32, #tpu.memory_space<vmem>>, %arg2: memref<256x128xf32, #tpu.memory_space<vmem>>, %arg3: memref<256x128xi8, #tpu.memory_space<vmem>>, %arg4: memref<1x1x128xf32, #tpu.memory_space<vmem>>) attributes {dimension_semantics = [#tpu.dimension_semantics<parallel>], iteration_bounds = array<i64: 1>, scalar_prefetch = 0 : i64, scratch_operands = 0 : i64, tpu.core_type = #tpu.core_type<tc>, window_params = [{transform_indices = @transform_0, window_bounds = array<i64: 256, 128>}, {transform_indices = @transform_1, window_bounds = array<i64: 256, 128>}, {transform_indices = @transform_2, window_bounds = array<i64: 256, 128>}, {transform_indices = @transform_3, window_bounds = array<i64: 1, 1, 128>}]} {
    %c0 = arith.constant 0 : index
    %c0_0 = arith.constant 0 : index
    %0 = vector.load %arg1[%c0, %c0_0] : memref<256x128xf32, #tpu.memory_space<vmem>>, vector<256x128xf32>
    %c0_1 = arith.constant 0 : index
    %c0_2 = arith.constant 0 : index
    %1 = vector.load %arg2[%c0_1, %c0_2] : memref<256x128xf32, #tpu.memory_space<vmem>>, vector<256x128xf32>
    %c0_3 = arith.constant 0 : index
    %c0_4 = arith.constant 0 : index
    %2 = vector.load %arg3[%c0_3, %c0_4] : memref<256x128xi8, #tpu.memory_space<vmem>>, vector<256x128xi8>
    %c0_i8 = arith.constant 0 : i8
    %3 = vector.broadcast %c0_i8 : i8 to vector<256x128xi8>
    %4 = arith.cmpi ne, %2, %3 : vector<256x128xi8>
    %5 = math.log %0 : vector<256x128xf32>
    %cst = arith.constant -1.000000e+02 : f32
    %6 = vector.broadcast %cst : f32 to vector<256x128xf32>
    %7 = arith.maximumf %5, %6 : vector<256x128xf32>
    %cst_5 = arith.constant 1.000000e+00 : f32
    %8 = vector.broadcast %cst_5 : f32 to vector<256x128xf32>
    %9 = arith.subf %8, %0 : vector<256x128xf32>
    %10 = math.log %9 : vector<256x128xf32>
    %cst_6 = arith.constant -1.000000e+02 : f32
    %11 = vector.broadcast %cst_6 : f32 to vector<256x128xf32>
    %12 = arith.maximumf %10, %11 : vector<256x128xf32>
    %cst_7 = arith.constant 0.000000e+00 : f32
    %13 = vector.broadcast %cst_7 : f32 to vector<256x128xf32>
    %14 = arith.subf %13, %12 : vector<256x128xf32>
    %15 = arith.mulf %1, %7 : vector<256x128xf32>
    %cst_8 = arith.constant 1.000000e+00 : f32
    %16 = vector.broadcast %cst_8 : f32 to vector<256x128xf32>
    %17 = arith.subf %16, %1 : vector<256x128xf32>
    %18 = arith.mulf %17, %12 : vector<256x128xf32>
    %19 = arith.addf %15, %18 : vector<256x128xf32>
    %cst_9 = arith.constant 0.000000e+00 : f32
    %20 = vector.broadcast %cst_9 : f32 to vector<256x128xf32>
    %21 = arith.subf %20, %19 : vector<256x128xf32>
    %22 = arith.subf %1, %0 : vector<256x128xf32>
    %23 = arith.mulf %22, %22 : vector<256x128xf32>
    %24 = arith.mulf %21, %23 : vector<256x128xf32>
    %25 = arith.mulf %0, %0 : vector<256x128xf32>
    %26 = arith.mulf %14, %25 : vector<256x128xf32>
    %27 = arith.select %4, %24, %26 : vector<256x128xi1>, vector<256x128xf32>
    %cst_10 = arith.constant dense<0.000000e+00> : vector<128xf32>
    %28 = vector.multi_reduction <add>, %27, %cst_10 [0] : vector<256x128xf32> to vector<128xf32>
    %29 = vector.shape_cast %28 : vector<128xf32> to vector<1x128xf32>
    %30 = vector.shape_cast %29 : vector<1x128xf32> to vector<1x1x128xf32>
    %c0_11 = arith.constant 0 : index
    %c0_12 = arith.constant 0 : index
    %c0_13 = arith.constant 0 : index
    %31 = vector.load %arg4[%c0_11, %c0_12, %c0_13] : memref<1x1x128xf32, #tpu.memory_space<vmem>>, vector<1x1x128xf32>
    tpu.vector_store %arg4[%c0_11, %c0_12, %c0_13], %30 {strides = array<i32>} : memref<1x1x128xf32, #tpu.memory_space<vmem>>, vector<1x1x128xf32>,
    return
  }
  func.func @transform_0(%arg0: i32) -> (i32, i32) {
    %c0_i32 = arith.constant 0 : i32
    %c0_i32_0 = arith.constant 0 : i32
    return %arg0, %c0_i32 : i32, i32
  }
  func.func @transform_1(%arg0: i32) -> (i32, i32) {
    %c0_i32 = arith.constant 0 : i32
    %c0_i32_0 = arith.constant 0 : i32
    return %arg0, %c0_i32 : i32, i32
  }
  func.func @transform_2(%arg0: i32) -> (i32, i32) {
    %c0_i32 = arith.constant 0 : i32
    %c0_i32_0 = arith.constant 0 : i32
    return %arg0, %c0_i32 : i32, i32
  }
  func.func @transform_3(%arg0: i32) -> (i32, i32, i32) {
    %c0_i32 = arith.constant 0 : i32
    %c0_i32_0 = arith.constant 0 : i32
    %c0_i32_1 = arith.constant 0 : i32
    return %arg0, %c0_i32, %c0_i32_0 : i32, i32, i32
  }
}

</mosaic_0001>

<bundles_post_ra>
// kernel: tpu_custom_call.1
= control target key start
LH: loop header
LB: loop body
LE: loop exit
PB: predicated region body
PF: predicated region fallthrough
CT: control target
= control target key end

     0   :  { %8 = vsyncpa [#allocation3], 0  ;;  %s3010_s0 = inlined_call_operand.hbm [shape: f32[256,128], index: 0, kind: input, shape index: {}]   ;;  %s3011_s1 = inlined_call_operand.hbm [shape: f32[256,128], index: 1, kind: input, shape index: {}]   ;;  %s3012_s2 = inlined_call_operand.hbm [shape: s8[256,128], index: 2, kind: input, shape index: {}]   ;;  %s3013_s3 = inlined_call_operand.hbm [shape: f32[1,1,128], index: 3, kind: output, shape index: {}]  }
   0x1   :  { %9 = vsyncpa [#allocation6], 0 }
   0x2   :  { %10 = vsyncpa [#allocation4], 0  ;;  %s1293_s12 = smov [#allocation5]   ;;  %s1294_s14 = smov [#allocation2]  }
   0x3   :  { %s28_s13 = sshll.u32 %s1293_s12, 4  ;;  %s16_s15 = sshll.u32 %s1294_s14, 4  ;;  %s29_s13 = int_to_ptr.vmem [resolvable:$true] %s28_s13  ;;  %s1320_s15 = int_to_ptr.vmem [resolvable:$true] %s16_s15 }
   0x4   :  { %s1199_s18 = scalar_lea.hbm %s3011_s1, 4096 }
   0x5   :  { %p1200_p0 = scmp.ne.s32.totalorder %s3011_s1, %s1199_s18  ;;  %p1203_p1 = scmp.lt.u32.totalorder %s1199_s18, %s3011_s1 }
   0x7   :  { %p1205_p2 = pnand %p1203_p1, %p1200_p0 }
   0x9   :  { %1208 = shalt.err (!%p1205_p2)
}
   0xa   :  { %s1209_s23 = scalar_lea.vmem %s29_s13, 4096  ;;  %p1214_p4 = scmp.lt.s32.totalorder %s29_s13, %s29_s13 }
   0xb   :  { %p1210_p3 = scmp.ne.s32.totalorder %s29_s13, %s1209_s23  ;;  %p1215_p5 = scmp.lt.s32.totalorder %s1209_s23, %s1209_s23 }
   0xd   :  { %p1216_p6 = por %p1215_p5, %p1214_p4 }
   0xf   :  { %p1217_p7 = pnand %p1216_p6, %p1210_p3 }
  0x11   :  { %1220 = shalt.err (!%p1217_p7)
}
  0x12   :  { %s1295_s24 = smov 128   ;;  %s1296_s25 = smov 8  }
  0x13   :  { %34 = dma.hbm_to_vmem [thread:$0]  %s3011_s1, 4096, %s29_s13, [#allocation6], %s1295_s24, %s1295_s24, %s1296_s25  }
  0x14   :  { %s1221_s30 = scalar_lea.hbm %s3010_s0, 4096 }
  0x15   :  { %p1222_p8 = scmp.ne.s32.totalorder %s3010_s0, %s1221_s30  ;;  %p1225_p9 = scmp.lt.u32.totalorder %s1221_s30, %s3010_s0 }
  0x17   :  { %p1227_p10 = pnand %p1225_p9, %p1222_p8 }
  0x19   :  { %1230 = shalt.err (!%p1227_p10)
}
  0x1a   :  { %s1231_s8 = scalar_lea.vmem %s1320_s15, 4096  ;;  %p1236_p12 = scmp.lt.s32.totalorder %s1320_s15, %s1320_s15 }
  0x1b   :  { %p1232_p11 = scmp.ne.s32.totalorder %s1320_s15, %s1231_s8  ;;  %p1237_p13 = scmp.lt.s32.totalorder %s1231_s8, %s1231_s8 }
  0x1d   :  { %p1238_p0 = por %p1237_p13, %p1236_p12 }
  0x1f   :  { %p1239_p1 = pnand %p1238_p0, %p1232_p11 }
  0x21   :  { %1242 = shalt.err (!%p1239_p1)
}
  0x22   :  { %22 = dma.hbm_to_vmem [thread:$0]  %s3010_s0, 4096, %s1320_s15, [#allocation3], %s1295_s24, %s1295_s24, %s1296_s25  }
  0x23   :  { %s1297_s10 = smov [#allocation7]   ;;  %s1243_s14 = scalar_lea.hbm %s3012_s2, 1024 }
  0x24   :  { %s40_s11 = sshll.u32 %s1297_s10, 4  ;;  %p1244_p2 = scmp.ne.s32.totalorder %s3012_s2, %s1243_s14  ;;  %s41_s11 = int_to_ptr.vmem [resolvable:$true] %s40_s11 }
  0x25   :  { %p1247_p3 = scmp.lt.u32.totalorder %s1243_s14, %s3012_s2 }
  0x27   :  { %p1249_p4 = pnand %p1247_p3, %p1244_p2 }
  0x29   :  { %1252 = shalt.err (!%p1249_p4)
}
  0x2a   :  { %s1253_s20 = scalar_lea.vmem %s41_s11, 1024  ;;  %p1258_p6 = scmp.lt.s32.totalorder %s41_s11, %s41_s11 }
  0x2b   :  { %p1254_p5 = scmp.ne.s32.totalorder %s41_s11, %s1253_s20  ;;  %p1259_p7 = scmp.lt.s32.totalorder %s1253_s20, %s1253_s20 }
  0x2d   :  { %p1260_p8 = por %p1259_p7, %p1258_p6 }
  0x2f   :  { %p1261_p9 = pnand %p1260_p8, %p1254_p5 }
  0x31   :  { %1264 = shalt.err (!%p1261_p9)
}
  0x32   :  { %46 = dma.hbm_to_vmem [thread:$0]  %s3012_s2, 1024, %s41_s11, [#allocation6], %s1295_s24, %s1295_s24, %s1296_s25  }
  0x33   :  { %1287 = dma.done.wait [#allocation3], 4096  }
  0x34   :  { %1288 = vsyncadd [#allocation3], 4294963200 }
  0x35   :  { %1289 = dma.done.wait [#allocation6], 5120  }
  0x36   :  { %1290 = vsyncadd [#allocation6], 4294962176  ;;  %v1372_v0 = vld [vmem:[#allocation2] sm:$0xff]  ;;  %v1374_v1 = vld [vmem:[#allocation2 + $0x8] sm:$0xff]  ;;  %s1299_s2 = smov [#allocation8]  }
  0x37   :  { %1039 = vlog2.f32 %v1372_v0  ;;  %v1377_v2 = vld [vmem:[#allocation2 + $0x10] sm:$0xff]  ;;  %v1380_v3 = vld [vmem:[#allocation2 + $0x18] sm:$0xff]  ;;  %v1383_v4 = vld [vmem:[#allocation2 + $0x20] sm:$0xff]  ;;  %s1022_s21 = sshll.u32 %s1299_s2, 4  ;;  %s1023_s21 = int_to_ptr.vmem [resolvable:$true] %s1022_s21 }
  0x38   :  { %1041 = vlog2.f32 %v1374_v1  ;;  %v1386_v5 = vld [vmem:[#allocation2 + $0x28] sm:$0xff]  ;;  %v1389_v6 = vld [vmem:[#allocation2 + $0x30] sm:$0xff]  ;;  %v1391_v7 = vld [vmem:[#allocation2 + $0x38] sm:$0xff]  ;;  %s1265_s22 = scalar_lea.vmem %s1023_s21, 16  ;;  %s1269_s23 = scalar_lea.vmem %s1023_s21, 32 }
  0x39   :  { %1043 = vlog2.f32 %v1377_v2  ;;  %v1393_v8 = vld [vmem:[#allocation2 + $0x40] sm:$0xff]  ;;  %v1396_v9 = vld [vmem:[#allocation2 + $0x48] sm:$0xff]  ;;  %v1398_v10 = vld [vmem:[#allocation2 + $0x50] sm:$0xff]  ;;  %p1266_p10 = scmp.ne.s32.totalorder %s1023_s21, %s1265_s22  ;;  %p1270_p11 = scmp.lt.s32.totalorder %s1023_s21, %s1023_s21 }
  0x3a   :  { %1045 = vlog2.f32 %v1380_v3  ;;  %v1400_v11 = vld [vmem:[#allocation2 + $0x58] sm:$0xff]  ;;  %v1406_v15 = vld [vmem:[#allocation2 + $0x60] sm:$0xff]  ;;  %v1408_v16 = vld [vmem:[#allocation2 + $0x68] sm:$0xff]  ;;  %p1271_p12 = scmp.lt.s32.totalorder %s1269_s23, %s1265_s22 }
  0x3b   :  { %1047 = vlog2.f32 %v1383_v4  ;;  %v1410_v17 = vld [vmem:[#allocation2 + $0x70] sm:$0xff]  ;;  %v1416_v21 = vld [vmem:[#allocation2 + $0x78] sm:$0xff]  ;;  %v1418_v22 = vld [vmem:[#allocation2 + $0x80] sm:$0xff] }
  0x3c   :  { %1049 = vlog2.f32 %v1386_v5  ;;  %v1420_v23 = vld [vmem:[#allocation2 + $0x88] sm:$0xff]  ;;  %v1426_v27 = vld [vmem:[#allocation2 + $0x90] sm:$0xff]  ;;  %v1428_v28 = vld [vmem:[#allocation2 + $0x98] sm:$0xff]  ;;  %p1272_p13 = por %p1271_p12, %p1270_p11 }
  0x3d   :  { %1051 = vlog2.f32 %v1389_v6  ;;  %v1430_v29 = vld [vmem:[#allocation2 + $0xa0] sm:$0xff]  ;;  %v1436_v34 = vld [vmem:[#allocation2 + $0xa8] sm:$0xff]  ;;  %v1438_v35 = vld [vmem:[#allocation2 + $0xb0] sm:$0xff] }
  0x3e   :  { %1053 = vlog2.f32 %v1391_v7  ;;  %v1440_v36 = vld [vmem:[#allocation2 + $0xb8] sm:$0xff]  ;;  %v1446_v41 = vld [vmem:[#allocation2 + $0xc0] sm:$0xff]  ;;  %v1448_v42 = vld [vmem:[#allocation2 + $0xc8] sm:$0xff]  ;;  %p1273_p0 = pnand %p1272_p13, %p1266_p10 }
  0x3f   :  { %1055 = vlog2.f32 %v1393_v8  ;;  %v1450_v43 = vld [vmem:[#allocation2 + $0xd0] sm:$0xff]  ;;  %v1460_v52 = vld [vmem:[#allocation2 + $0xd8] sm:$0xff]  ;;  %v1462_v53 = vld [vmem:[#allocation2 + $0xe0] sm:$0xff] }
  0x40   :  { %1057 = vlog2.f32 %v1396_v9  ;;  %3113 = vst [vmem:[#allocation12_spill] sm:$0xff] %v1460_v52  ;;  %3114 = vst [vmem:[#allocation13_spill] sm:$0xff] %v1462_v53  ;;  %v1468_v58 = vld [vmem:[#allocation2 + $0xe8] sm:$0xff]  ;;  %v1470_v59 = vld [vmem:[#allocation2 + $0xf0] sm:$0xff] }
  0x41   :  { %v1040_v33 = vpop.eup %1039  ;;  %1059 = vlog2.f32 %v1398_v10  ;;  %3115 = vst [vmem:[#allocation14_spill] sm:$0xff] %v1468_v58  ;;  %3116 = vst [vmem:[#allocation15_spill] sm:$0xff] %v1470_v59  ;;  %v1472_v60 = vld [vmem:[#allocation2 + $0xf8] sm:$0xff]  ;;  %v1478_v50 = vld [vmem:[#allocation5] sm:$0xff] }
  0x42   :  { %v1042_v40 = vpop.eup %1041  ;;  %1061 = vlog2.f32 %v1400_v11  ;;  %3117 = vst [vmem:[#allocation16_spill] sm:$0xff] %v1472_v60  ;;  %3118 = vst [vmem:[#allocation17_spill] sm:$0xff] %v1478_v50  ;;  %v1480_v55 = vld [vmem:[#allocation5 + $0x8] sm:$0xff]  ;;  %v139_v56 = vmul.f32 0.6931472, %v1040_v33  ;;  %v1499_v30 = vsub.f32 %v1478_v50, %v1372_v0  ;;  %v1501_v26 = vld [vmem:[#allocation5 + $0x18] sm:$0xff] }
  0x43   :  { %v1044_v47 = vpop.eup %1043  ;;  %1063 = vlog2.f32 %v1406_v15  ;;  %3119 = vst [vmem:[#allocation18_spill] sm:$0xff] %v1480_v55  ;;  %v141_v49 = vmul.f32 0.6931472, %v1042_v40  ;;  %v1489_v40 = vld [vmem:[#allocation5 + $0x10] sm:$0xff]  ;;  %v1518_v38 = vsub.f32 %v1501_v26, %v1380_v3 }
  0x44   :  { %v1046_v51 = vpop.eup %1045  ;;  %1065 = vlog2.f32 %v1408_v16  ;;  %v143_v46 = vmul.f32 0.6931472, %v1044_v47  ;;  %3120 = vst [vmem:[#allocation19_spill] sm:$0xff] %v1489_v40  ;;  %3121 = vst [vmem:[#allocation20_spill] sm:$0xff] %v1499_v30 }
  0x45   :  { %v1048_v57 = vpop.eup %1047  ;;  %1067 = vlog2.f32 %v1410_v17  ;;  %v145_v44 = vmul.f32 0.6931472, %v1046_v51  ;;  %v202_v51 = vmax.f32 %v139_v56, -100.0  ;;  %v203_v32 = vmax.f32 %v141_v49, -100.0  ;;  %3124 = vst [vmem:[#allocation23_spill] sm:$0xff] %v1518_v38  ;;  %v1535_v38 = vld [vmem:[#allocation5 + $0x20] sm:$0xff] }
  0x46   :  { %v1050_v54 = vpop.eup %1049  ;;  %1069 = vlog2.f32 %v1416_v21  ;;  %v147_v37 = vmul.f32 0.6931472, %v1048_v57  ;;  %v204_v39 = vmax.f32 %v143_v46, -100.0  ;;  %v1507_v49 = vsub.f32 %v1480_v55, %v1374_v1  ;;  %3129 = vst [vmem:[#allocation28_spill] sm:$0xff] %v1535_v38 }
  0x47   :  { %v1052_v48 = vpop.eup %1051  ;;  %1071 = vlog2.f32 %v1418_v22  ;;  %v149_v31 = vmul.f32 0.6931472, %v1050_v54  ;;  %v205_v45 = vmax.f32 %v145_v44, -100.0  ;;  %v1514_v46 = vsub.f32 %v1489_v40, %v1377_v2 }
  0x48   :  { %v1054_v62 = vpop.eup %1053  ;;  %1073 = vlog2.f32 %v1420_v23  ;;  %3122 = vst [vmem:[#allocation21_spill] sm:$0xff] %v1507_v49  ;;  %v1509_v56 = vmul.f32 0.6931472, %v1052_v48  ;;  %v206_v57 = vmax.f32 %v147_v37, -100.0  ;;  %v1522_v25 = vmul.f32 %v202_v51, %v1478_v50 }
  0x49   :  { %v1056_v33 = vpop.eup %1055  ;;  %1075 = vlog2.f32 %v1426_v27  ;;  %3123 = vst [vmem:[#allocation22_spill] sm:$0xff] %v1514_v46  ;;  %v1525_v48 = vmul.f32 %v203_v32, %v1480_v55  ;;  %v153_v20 = vmul.f32 0.6931472, %v1054_v62  ;;  %v207_v19 = vmax.f32 %v149_v31, -100.0  ;;  %v1541_v62 = vld [vmem:[#allocation5 + $0x28] sm:$0xff] }
  0x4a   :  { %v1058_v61 = vpop.eup %1057  ;;  %1077 = vlog2.f32 %v1428_v28  ;;  %3125 = vst [vmem:[#allocation24_spill] sm:$0xff] %v1522_v25  ;;  %v1529_v18 = vmul.f32 %v204_v39, %v1489_v40  ;;  %v155_v13 = vmul.f32 0.6931472, %v1056_v33  ;;  %v1533_v37 = vmul.f32 %v205_v45, %v1501_v26  ;;  %3130 = vst [vmem:[#allocation29_spill] sm:$0xff] %v1541_v62  ;;  %v1566_v25 = vld [vmem:[#allocation5 + $0x30] sm:$0xff] }
  0x4b   :  { %v1060_v63 = vpop.eup %1059  ;;  %1079 = vlog2.f32 %v1430_v29  ;;  %3126 = vst [vmem:[#allocation25_spill] sm:$0xff] %v1525_v48  ;;  %v157_v12 = vmul.f32 0.6931472, %v1058_v61  ;;  %v208_v31 = vmax.f32 %v1509_v56, -100.0  ;;  %v1547_v45 = vmul.f32 %v206_v57, %v1535_v38  ;;  %3133 = vst [vmem:[#allocation32_spill] sm:$0xff] %v1566_v25 }
  0x4c   :  { %v1062_v47 = vpop.eup %1061  ;;  %1081 = vlog2.f32 %v1436_v34  ;;  %3127 = vst [vmem:[#allocation26_spill] sm:$0xff] %v1529_v18  ;;  %3128 = vst [vmem:[#allocation27_spill] sm:$0xff] %v1533_v37  ;;  %v159_v32 = vmul.f32 0.6931472, %v1060_v63  ;;  %v209_v63 = vmax.f32 %v153_v20, -100.0  ;;  %v3134_v40 = vsub.f32 1.0, %v1372_v0 }
  0x4d   :  { %v1064_v54 = vpop.eup %1063  ;;  %1083 = vlog2.f32 %v1438_v35  ;;  %v1537_v46 = vmul.f32 0.6931472, %v1062_v47  ;;  %3131 = vst [vmem:[#allocation30_spill] sm:$0xff] %v1547_v45  ;;  %v1553_v47 = vmul.f32 %v207_v19, %v1541_v62 }
  0x4e   :  { %v1066_v44 = vpop.eup %1065  ;;  %1085 = vlog2.f32 %v1440_v36  ;;  %v163_v33 = vmul.f32 0.6931472, %v1064_v54  ;;  %v210_v54 = vmax.f32 %v155_v13, -100.0 }
  0x4f   :  { %v1068_v24 = vpop.eup %1067  ;;  %1087 = vlog2.f32 %v1446_v41  ;;  %v1543_v61 = vmul.f32 0.6931472, %v1066_v44  ;;  %3132 = vst [vmem:[#allocation31_spill] sm:$0xff] %v1553_v47  ;;  %v211_v44 = vmax.f32 %v157_v12, -100.0  ;;  %v213_v57 = vmax.f32 %v1537_v46, -100.0  ;;  %v1571_v46 = vld [vmem:[#allocation5 + $0x38] sm:$0xff] }
  0x50   :  { %v1070_v14 = vpop.eup %1069  ;;  %1089 = vlog2.f32 %v1448_v42  ;;  %v1549_v30 = vmul.f32 0.6931472, %v1068_v24  ;;  %v212_v24 = vmax.f32 %v159_v32, -100.0  ;;  %v214_v19 = vmax.f32 %v163_v33, -100.0  ;;  %3135 = vst [vmem:[#allocation33_spill] sm:$0xff] %v1571_v46 }
  0x51   :  { %v1072_v51 = vpop.eup %1071  ;;  %1091 = vlog2.f32 %v1450_v43  ;;  %v1555_v37 = vmul.f32 0.6931472, %v1070_v14  ;;  %v215_v14 = vmax.f32 %v1543_v61, -100.0  ;;  %v3136_v33 = vsub.f32 1.0, %v1374_v1 }
  0x52   :  { %v1074_v39 = vpop.eup %1073  ;;  %1093 = vlog2.f32 %v1460_v52  ;;  %v1558_v48 = vmul.f32 0.6931472, %v1072_v51  ;;  %v216_v51 = vmax.f32 %v1549_v30, -100.0  ;;  %v1579_v61 = vmul.f32 %v208_v31, %v1566_v25  ;;  %v1583_v30 = vld [vmem:[#allocation5 + $0x48] sm:$0xff] }
  0x53   :  { %v1076_v49 = vpop.eup %1075  ;;  %1095 = vlog2.f32 %v1462_v53  ;;  %v1562_v20 = vmul.f32 0.6931472, %v1074_v39  ;;  %v217_v55 = vmax.f32 %v1555_v37, -100.0  ;;  %3139 = vst [vmem:[#allocation36_spill] sm:$0xff] %v1583_v30  ;;  %v1591_v37 = vmul.f32 %v209_v63, %v1571_v46 }
  0x54   :  { %v1078_v56 = vpop.eup %1077  ;;  %1097 = vlog2.f32 %v1468_v58  ;;  %v175_v12 = vmul.f32 0.6931472, %v1076_v49  ;;  %3137 = vst [vmem:[#allocation34_spill] sm:$0xff] %v1579_v61  ;;  %v3143_v61 = vsub.f32 1.0, %v1380_v3  ;;  %v3148_v46 = vsub.f32 1.0, %v1383_v4  ;;  %v1624_v4 = vld [vmem:[#allocation5 + $0x70] sm:$0xff] }
  0x55   :  { %v1080_v18 = vpop.eup %1079  ;;  %1099 = vlog2.f32 %v1470_v59  ;;  %v177_v13 = vmul.f32 0.6931472, %v1078_v56  ;;  %v1581_v56 = vld [vmem:[#allocation5 + $0x40] sm:$0xff]  ;;  %3141 = vst [vmem:[#allocation37_spill] sm:$0xff] %v1591_v37  ;;  %v219_v31 = vmax.f32 %v1562_v20, -100.0  ;;  %3154 = vst [vmem:[#allocation47_spill] sm:$0xff] %v1624_v4 }
  0x56   :  { %v1082_v45 = vpop.eup %1081  ;;  %1101 = vlog2.f32 %v1472_v60  ;;  %v1573_v39 = vmul.f32 0.6931472, %v1080_v18  ;;  %3138 = vst [vmem:[#allocation35_spill] sm:$0xff] %v1581_v56  ;;  %v3140_v18 = vsub.f32 1.0, %v1377_v2  ;;  %v1599_v50 = vmul.f32 %v210_v54, %v1581_v56  ;;  %v1604_v2 = vld [vmem:[#allocation5 + $0x58] sm:$0xff] }
  0x57   :  { %v1084_v47 = vpop.eup %1083  ;;  %1103 = vlog2.f32 %v3134_v40  ;;  %v1585_v0 = vmul.f32 0.6931472, %v1082_v45  ;;  %v218_v40 = vmax.f32 %v1558_v48, -100.0  ;;  %v1602_v45 = vmul.f32 %v211_v44, %v1583_v30  ;;  %3146 = vst [vmem:[#allocation41_spill] sm:$0xff] %v1604_v2 }
  0x58   :  { %v1086_v32 = vpop.eup %1085  ;;  %1105 = vlog2.f32 %v3136_v33  ;;  %v1593_v33 = vld [vmem:[#allocation5 + $0x50] sm:$0xff]  ;;  %3144 = vst [vmem:[#allocation39_spill] sm:$0xff] %v1599_v50  ;;  %v220_v63 = vmax.f32 %v175_v12, -100.0  ;;  %v221_v37 = vmax.f32 %v177_v13, -100.0  ;;  %v222_v54 = vmax.f32 %v1573_v39, -100.0 }
  0x59   :  { %v1088_v49 = vpop.eup %1087  ;;  %1107 = vlog2.f32 %v3140_v18  ;;  %3142 = vst [vmem:[#allocation38_spill] sm:$0xff] %v1593_v33  ;;  %3145 = vst [vmem:[#allocation40_spill] sm:$0xff] %v1602_v45  ;;  %v1606_v18 = vld [vmem:[#allocation5 + $0x60] sm:$0xff]  ;;  %v1611_v20 = vmul.f32 %v212_v24, %v1593_v33  ;;  %v3151_v44 = vsub.f32 1.0, %v1386_v5  ;;  %v1619_v45 = vmul.f32 %v213_v57, %v1604_v2 }
  0x5a   :  { %v1090_v1 = vpop.eup %1089  ;;  %1109 = vlog2.f32 %v3143_v61  ;;  %3147 = vst [vmem:[#allocation42_spill] sm:$0xff] %v1606_v18  ;;  %v1613_v61 = vld [vmem:[#allocation5 + $0x68] sm:$0xff]  ;;  %v1622_v12 = vmul.f32 %v214_v19, %v1606_v18  ;;  %v183_v24 = vmul.f32 0.6931472, %v1084_v47  ;;  %v3156_v50 = vsub.f32 1.0, %v1389_v6  ;;  %v1634_v57 = vld [vmem:[#allocation5 + $0x80] sm:$0xff] }
  0x5b   :  { %v1092_v48 = vpop.eup %1091  ;;  %1111 = vlog2.f32 %v3148_v46  ;;  %3149 = vst [vmem:[#allocation43_spill] sm:$0xff] %v1611_v20  ;;  %3150 = vst [vmem:[#allocation44_spill] sm:$0xff] %v1613_v61  ;;  %v1626_v46 = vld [vmem:[#allocation5 + $0x78] sm:$0xff]  ;;  %v223_v20 = vmax.f32 %v1585_v0, -100.0  ;;  %v1632_v5 = vmul.f32 %v215_v14, %v1613_v61  ;;  %v185_v19 = vmul.f32 0.6931472, %v1086_v32 }
  0x5c   :  { %v1094_v3 = vpop.eup %1093  ;;  %1113 = vlog2.f32 %v3151_v44  ;;  %3152 = vst [vmem:[#allocation45_spill] sm:$0xff] %v1619_v45  ;;  %3153 = vst [vmem:[#allocation46_spill] sm:$0xff] %v1622_v12  ;;  %v1636_v44 = vld [vmem:[#allocation5 + $0x88] sm:$0xff]  ;;  %v3160_v12 = vsub.f32 1.0, %v1391_v7  ;;  %v1641_v45 = vmul.f32 %v216_v51, %v1624_v4  ;;  %v1644_v47 = vmul.f32 %v217_v55, %v1626_v46  ;;  %v1648_v14 = vld [vmem:[#allocation5 + $0x98] sm:$0xff] }
  0x5d   :  { %v1096_v13 = vpop.eup %1095  ;;  %3155 = vst [vmem:[#allocation48_spill] sm:$0xff] %v1626_v46  ;;  %1115 = vlog2.f32 %v3156_v50  ;;  %3157 = vst [vmem:[#allocation49_spill] sm:$0xff] %v1632_v5  ;;  %v1646_v50 = vld [vmem:[#allocation5 + $0x90] sm:$0xff]  ;;  %v187_v0 = vmul.f32 0.6931472, %v1088_v49  ;;  %v3165_v5 = vsub.f32 1.0, %v1393_v8  ;;  %v1653_v32 = vmul.f32 %v218_v40, %v1634_v57 }
  0x5e   :  { %v1098_v39 = vpop.eup %1097  ;;  %3158 = vst [vmem:[#allocation50_spill] sm:$0xff] %v1634_v57  ;;  %3159 = vst [vmem:[#allocation51_spill] sm:$0xff] %v1636_v44  ;;  %1117 = vlog2.f32 %v3160_v12  ;;  %v1656_v7 = vmul.f32 %v219_v31, %v1636_v44  ;;  %v189_v12 = vmul.f32 0.6931472, %v1090_v1  ;;  %v3168_v55 = vsub.f32 1.0, %v1396_v9 }
  0x5f   :  { %3161 = vst [vmem:[#allocation52_spill] sm:$0xff] %v1641_v45  ;;  %3162 = vst [vmem:[#allocation53_spill] sm:$0xff] %v1644_v47  ;;  %v1100_v6 = vpop.eup %1099  ;;  %1119 = vlog2.f32 %v3165_v5  ;;  %v1661_v47 = vmul.f32 %v220_v63, %v1646_v50  ;;  %v1664_v45 = vmul.f32 %v221_v37, %v1648_v14  ;;  %v191_v8 = vmul.f32 0.6931472, %v1092_v48 }
  0x60   :  { %3163 = vst [vmem:[#allocation54_spill] sm:$0xff] %v1646_v50  ;;  %3164 = vst [vmem:[#allocation55_spill] sm:$0xff] %v1648_v14  ;;  %v1102_v51 = vpop.eup %1101  ;;  %1121 = vlog2.f32 %v3168_v55  ;;  %v193_v5 = vmul.f32 0.6931472, %v1094_v3  ;;  %v224_v46 = vmax.f32 %v183_v24, -100.0  ;;  %v3171_v40 = vsub.f32 1.0, %v1398_v10 }
  0x61   :  { %3166 = vst [vmem:[#allocation56_spill] sm:$0xff] %v1653_v32  ;;  %3167 = vst [vmem:[#allocation57_spill] sm:$0xff] %v1656_v7  ;;  %v1104_v49 = vpop.eup %1103  ;;  %v1668_v7 = vld [vmem:[#allocation5 + $0xa0] sm:$0xff]  ;;  %v195_v1 = vmul.f32 0.6931472, %v1096_v13  ;;  %v225_v9 = vmax.f32 %v185_v19, -100.0 }
  0x62   :  { %3169 = vst [vmem:[#allocation58_spill] sm:$0xff] %v1661_v47  ;;  %3170 = vst [vmem:[#allocation59_spill] sm:$0xff] %v1664_v45  ;;  %1123 = vlog2.f32 %v3171_v40  ;;  %v1106_v31 = vpop.eup %1105  ;;  %v197_v32 = vmul.f32 0.6931472, %v1098_v39  ;;  %v3173_v55 = vsub.f32 1.0, %v1400_v11  ;;  %v1672_v47 = vld [vmem:[#allocation5 + $0xa8] sm:$0xff]  ;;  %v1677_v10 = vmul.f32 %v222_v54, %v1668_v7 }
  0x63   :  { %3172 = vst [vmem:[#allocation60_spill] sm:$0xff] %v1668_v7  ;;  %v1108_v63 = vpop.eup %1107  ;;  %3174 = vst [vmem:[#allocation61_spill] sm:$0xff] %v1672_v47  ;;  %v199_v37 = vmul.f32 0.6931472, %v1100_v6  ;;  %v226_v45 = vmax.f32 %v187_v0, -100.0  ;;  %v3175_v48 = vsub.f32 1.0, %v1406_v15  ;;  %v1684_v11 = vmul.f32 %v223_v20, %v1672_v47 }
  0x64   :  { %1125 = vlog2.f32 %v3173_v55  ;;  %3176 = vst [vmem:[#allocation62_spill] sm:$0xff] %v1677_v10  ;;  %v1110_v3 = vpop.eup %1109  ;;  %v1679_v24 = vld [vmem:[#allocation5 + $0xb0] sm:$0xff]  ;;  %v201_v13 = vmul.f32 0.6931472, %v1102_v51  ;;  %v227_v39 = vmax.f32 %v189_v12, -100.0  ;;  %v3178_v19 = vsub.f32 1.0, %v1408_v16 }
  0x65   :  { %1127 = vlog2.f32 %v3175_v48  ;;  %3177 = vst [vmem:[#allocation63_spill] sm:$0xff] %v1679_v24  ;;  %3179 = vst [vmem:[#allocation64_spill] sm:$0xff] %v1684_v11  ;;  %v1112_v40 = vpop.eup %1111  ;;  %v1686_v6 = vld [vmem:[#allocation5 + $0xb8] sm:$0xff]  ;;  %v228_v0 = vmax.f32 %v191_v8, -100.0  ;;  %v229_v15 = vmax.f32 %v193_v5, -100.0  ;;  %v3181_v55 = vsub.f32 1.0, %v1410_v17 }
  0x66   :  { %1129 = vlog2.f32 %v3178_v19  ;;  %3180 = vst [vmem:[#allocation65_spill] sm:$0xff] %v1686_v6  ;;  %v1691_v54 = vmul.f32 %v224_v46, %v1679_v24  ;;  %v1114_v48 = vpop.eup %1113  ;;  %v1693_v51 = vld [vmem:[#allocation5 + $0xc0] sm:$0xff]  ;;  %v230_v12 = vmax.f32 %v195_v1, -100.0  ;;  %v231_v16 = vmax.f32 %v197_v32, -100.0  ;;  %v1700_v8 = vld [vmem:[#allocation5 + $0xc8] sm:$0xff]  ;;  %v1709_v32 = vld [vmem:[#allocation5 + $0xd0] sm:$0xff] }
  0x67   :  { %1131 = vlog2.f32 %v3181_v55  ;;  %3183 = vst [vmem:[#allocation67_spill] sm:$0xff] %v1693_v51  ;;  %v3184_v19 = vsub.f32 1.0, %v1416_v21  ;;  %v1698_v20 = vmul.f32 %v225_v9, %v1686_v6  ;;  %v1116_v11 = vpop.eup %1115  ;;  %3186 = vst [vmem:[#allocation69_spill] sm:$0xff] %v1700_v8  ;;  %v232_v5 = vmax.f32 %v199_v37, -100.0  ;;  %v1711_v21 = vld [vmem:[#allocation5 + $0xd8] sm:$0xff] }
  0x68   :  { %3182 = vst [vmem:[#allocation66_spill] sm:$0xff] %v1691_v54  ;;  %v1702_v17 = vmul.f32 0.6931472, %v1104_v49  ;;  %v3187_v46 = vsub.f32 1.0, %v1418_v22  ;;  %v1707_v55 = vmul.f32 %v226_v45, %v1693_v51  ;;  %v1118_v1 = vpop.eup %1117  ;;  %3189 = vst [vmem:[#allocation71_spill] sm:$0xff] %v1709_v32  ;;  %v1718_v49 = vmul.f32 %v227_v39, %v1700_v8  ;;  %v1720_v22 = vld [vmem:[#allocation5 + $0xe0] sm:$0xff] }
  0x69   :  { %1133 = vlog2.f32 %v3184_v19  ;;  %3185 = vst [vmem:[#allocation68_spill] sm:$0xff] %v1698_v20  ;;  %3190 = vst [vmem:[#allocation72_spill] sm:$0xff] %v1711_v21  ;;  %v233_v19 = vmax.f32 %v201_v13, -100.0  ;;  %v1713_v9 = vmul.f32 0.6931472, %v1106_v31  ;;  %v3191_v20 = vsub.f32 1.0, %v1420_v23  ;;  %v1120_v37 = vpop.eup %1119 }
  0x6a   :  { %1135 = vlog2.f32 %v3187_v46  ;;  %3188 = vst [vmem:[#allocation70_spill] sm:$0xff] %v1707_v55  ;;  %3192 = vst [vmem:[#allocation73_spill] sm:$0xff] %v1718_v49  ;;  %v1722_v46 = vld [vmem:[#allocation5 + $0xe8] sm:$0xff]  ;;  %v1724_v45 = vmul.f32 0.6931472, %v1108_v63  ;;  %v3195_v55 = vsub.f32 1.0, %v1426_v27  ;;  %v1729_v13 = vmul.f32 %v228_v0, %v1709_v32  ;;  %v1122_v23 = vpop.eup %1121 }
  0x6b   :  { %1137 = vlog2.f32 %v3191_v20  ;;  %3193 = vst [vmem:[#allocation74_spill] sm:$0xff] %v1720_v22  ;;  %3194 = vst [vmem:[#allocation75_spill] sm:$0xff] %v1722_v46  ;;  %v1732_v31 = vmul.f32 %v229_v15, %v1711_v21  ;;  %v1734_v20 = vld [vmem:[#allocation5 + $0xf0] sm:$0xff]  ;;  %v1736_v39 = vmul.f32 0.6931472, %v1110_v3  ;;  %v3199_v49 = vsub.f32 1.0, %v1428_v28 }
  0x6c   :  { %1139 = vlog2.f32 %v3195_v55  ;;  %3196 = vst [vmem:[#allocation76_spill] sm:$0xff] %v1729_v13  ;;  %3198 = vst [vmem:[#allocation78_spill] sm:$0xff] %v1734_v20  ;;  %v1741_v63 = vmul.f32 %v230_v12, %v1720_v22  ;;  %v1744_v27 = vmul.f32 %v231_v16, %v1722_v46  ;;  %v1124_v55 = vpop.eup %1123  ;;  %v1746_v0 = vld [vmem:[#allocation5 + $0xf8] sm:$0xff]  ;;  %v1748_v13 = vmul.f32 0.6931472, %v1112_v40 }
  0x6d   :  { %3197 = vst [vmem:[#allocation77_spill] sm:$0xff] %v1732_v31  ;;  %1141 = vlog2.f32 %v3199_v49  ;;  %3202 = vst [vmem:[#allocation81_spill] sm:$0xff] %v1746_v0  ;;  %v3203_v15 = vsub.f32 1.0, %v1430_v29  ;;  %v3021_v3 = vmax.f32 %v1702_v17, -100.0  ;;  %v1754_v31 = vmul.f32 %v232_v5, %v1734_v20 }
  0x6e   :  { %3200 = vst [vmem:[#allocation79_spill] sm:$0xff] %v1741_v63  ;;  %3201 = vst [vmem:[#allocation80_spill] sm:$0xff] %v1744_v27  ;;  %v1126_v28 = vpop.eup %1125  ;;  %v1756_v49 = vmul.f32 0.6931472, %v1114_v48  ;;  %v3205_v12 = vsub.f32 1.0, %v1436_v34  ;;  %v3022_v16 = vmax.f32 %v1713_v9, -100.0  ;;  %v1762_v27 = vmul.f32 %v233_v19, %v1746_v0 }
  0x6f   :  { %1143 = vlog2.f32 %v3203_v15  ;;  %3204 = vst [vmem:[#allocation82_spill] sm:$0xff] %v1754_v31  ;;  %v1128_v40 = vpop.eup %1127  ;;  %v1764_v63 = vmul.f32 0.6931472, %v1116_v11  ;;  %v3207_v29 = vsub.f32 1.0, %v1438_v35  ;;  %v1771_v48 = vsub.f32 0.0, %v3021_v3 }
  0x70   :  { %1145 = vlog2.f32 %v3205_v12  ;;  %3206 = vst [vmem:[#allocation83_spill] sm:$0xff] %v1762_v27  ;;  %v1130_v15 = vpop.eup %1129  ;;  %v1773_v34 = vmul.f32 0.6931472, %v1118_v1  ;;  %v3209_v12 = vsub.f32 1.0, %v1440_v36  ;;  %v1780_v11 = vsub.f32 0.0, %v3022_v16 }
  0x71   :  { %1147 = vlog2.f32 %v3207_v29  ;;  %3208 = vst [vmem:[#allocation84_spill] sm:$0xff] %v1771_v48  ;;  %v1132_v35 = vpop.eup %1131  ;;  %v1782_v29 = vmul.f32 0.6931472, %v1120_v37  ;;  %v3211_v5 = vsub.f32 1.0, %v1446_v41  ;;  %v3212_v1 = vmax.f32 %v1724_v45, -100.0 }
  0x72   :  { %1149 = vlog2.f32 %v3209_v12  ;;  %3210 = vst [vmem:[#allocation85_spill] sm:$0xff] %v1780_v11  ;;  %v1791_v12 = vmul.f32 0.6931472, %v1122_v23  ;;  %v3214_v19 = vsub.f32 1.0, %v1448_v42  ;;  %v3215_v37 = vmax.f32 %v1736_v39, -100.0 }
  0x73   :  { %1151 = vlog2.f32 %v3211_v5  ;;  %v1789_v48 = vsub.f32 0.0, %v3212_v1  ;;  %v1134_v36 = vpop.eup %1133  ;;  %v1800_v5 = vmul.f32 0.6931472, %v1124_v55  ;;  %v3217_v3 = vsub.f32 1.0, %v1450_v43 }
  0x74   :  { %1153 = vlog2.f32 %v3214_v19  ;;  %v1798_v11 = vsub.f32 0.0, %v3215_v37  ;;  %v1136_v41 = vpop.eup %1135  ;;  %v3218_v23 = vmax.f32 %v1748_v13, -100.0  ;;  %v1809_v19 = vmul.f32 0.6931472, %v1126_v28 }
  0x75   :  { %3213 = vst [vmem:[#allocation86_spill] sm:$0xff] %v1789_v48  ;;  %1155 = vlog2.f32 %v3217_v3  ;;  %v1138_v42 = vpop.eup %1137  ;;  %v3220_v16 = vsub.f32 1.0, %v1460_v52  ;;  %v3221_v55 = vmax.f32 %v1756_v49, -100.0  ;;  %v1818_v3 = vmul.f32 0.6931472, %v1128_v40 }
  0x76   :  { %3216 = vst [vmem:[#allocation87_spill] sm:$0xff] %v1798_v11  ;;  %v1807_v48 = vsub.f32 0.0, %v3218_v23  ;;  %v1140_v43 = vpop.eup %1139  ;;  %v3224_v1 = vsub.f32 1.0, %v1462_v53  ;;  %v3225_v28 = vmax.f32 %v1764_v63, -100.0  ;;  %v3227_v37 = vsub.f32 1.0, %v1468_v58 }
  0x77   :  { %1157 = vlog2.f32 %v3220_v16  ;;  %v1816_v11 = vsub.f32 0.0, %v3221_v55  ;;  %3223 = vst [vmem:[#allocation90_spill] sm:$0xff] %v1818_v3  ;;  %v1142_v52 = vpop.eup %1141  ;;  %v1827_v16 = vmul.f32 0.6931472, %v1130_v15  ;;  %v3228_v40 = vmax.f32 %v1773_v34, -100.0 }
  0x78   :  { %3219 = vst [vmem:[#allocation88_spill] sm:$0xff] %v1807_v48  ;;  %1159 = vlog2.f32 %v3224_v1  ;;  %v1825_v48 = vsub.f32 0.0, %v3225_v28  ;;  %v1836_v1 = vmul.f32 0.6931472, %v1132_v35  ;;  %v1838_v23 = vmul.f32 0.6931472, %v1134_v36 }
  0x79   :  { %3222 = vst [vmem:[#allocation89_spill] sm:$0xff] %v1816_v11  ;;  %1161 = vlog2.f32 %v3227_v37  ;;  %v1834_v11 = vsub.f32 0.0, %v3228_v40  ;;  %v1144_v53 = vpop.eup %1143  ;;  %v3232_v28 = vsub.f32 1.0, %v1470_v59  ;;  %v1843_v27 = vmul.f32 0.6931472, %v1136_v41 }
  0x7a   :  { %3226 = vst [vmem:[#allocation91_spill] sm:$0xff] %v1825_v48  ;;  %3230 = vst [vmem:[#allocation93_spill] sm:$0xff] %v1836_v1  ;;  %v1146_v48 = vpop.eup %1145  ;;  %v1845_v37 = vmul.f32 0.6931472, %v1138_v42  ;;  %v3234_v55 = vsub.f32 1.0, %v1472_v60  ;;  %v3236_v59 = vmax.f32 %v1782_v29, -100.0 }
  0x7b   :  { %3229 = vst [vmem:[#allocation92_spill] sm:$0xff] %v1834_v11  ;;  %3231 = vst [vmem:[#allocation94_spill] sm:$0xff] %v1838_v23  ;;  %1163 = vlog2.f32 %v3232_v28  ;;  %v1148_v11 = vpop.eup %1147  ;;  %v1850_v35 = vmul.f32 0.6931472, %v1140_v43  ;;  %v3238_v15 = vmax.f32 %v1791_v12, -100.0  ;;  %v3241_v40 = vmax.f32 %v1800_v5, -100.0 }
  0x7c   :  { %3233 = vst [vmem:[#allocation95_spill] sm:$0xff] %v1845_v37  ;;  %1165 = vlog2.f32 %v3234_v55  ;;  %v1855_v28 = vsub.f32 0.0, %v3236_v59  ;;  %v1150_v42 = vpop.eup %1149  ;;  %v1861_v58 = vmul.f32 0.6931472, %v1142_v52  ;;  %v3243_v43 = vmax.f32 %v1809_v19, -100.0 }
  0x7d   :  { %3235 = vst [vmem:[#allocation96_spill] sm:$0xff] %v1850_v35  ;;  %v1859_v41 = vsub.f32 0.0, %v3238_v15  ;;  %v1866_v60 = vsub.f32 0.0, %v3241_v40  ;;  %v1152_v31 = vpop.eup %1151  ;;  %v1872_v59 = vmul.f32 0.6931472, %v1144_v53  ;;  %v3246_v52 = vmax.f32 %v1818_v3, -100.0 }
  0x7e   :  { %3237 = vst [vmem:[#allocation97_spill] sm:$0xff] %v1855_v28  ;;  %3240 = vst [vmem:[#allocation99_spill] sm:$0xff] %v1861_v58  ;;  %v1870_v36 = vsub.f32 0.0, %v3243_v43  ;;  %v3030_v28 = vmax.f32 %v1836_v1, -100.0  ;;  %v1154_v55 = vpop.eup %1153  ;;  %v1880_v54 = vmul.f32 0.6931472, %v1146_v48 }
  0x7f   :  { %3239 = vst [vmem:[#allocation98_spill] sm:$0xff] %v1859_v41  ;;  %3242 = vst [vmem:[#allocation100_spill] sm:$0xff] %v1866_v60  ;;  %v1878_v41 = vsub.f32 0.0, %v3246_v52  ;;  %v3249_v43 = vmax.f32 %v1827_v16, -100.0  ;;  %v1156_v53 = vpop.eup %1155  ;;  %v1888_v10 = vmul.f32 0.6931472, %v1148_v11 }
  0x80   :  { %3244 = vst [vmem:[#allocation101_spill] sm:$0xff] %v1870_v36  ;;  %3245 = vst [vmem:[#allocation102_spill] sm:$0xff] %v1872_v59  ;;  %v1893_v52 = vsub.f32 0.0, %v3030_v28  ;;  %v3253_v48 = vmax.f32 %v1838_v23, -100.0  ;;  %v1899_v3 = vmul.f32 0.6931472, %v1150_v42 }
  0x81   :  { %3247 = vst [vmem:[#allocation103_spill] sm:$0xff] %v1878_v41  ;;  %3248 = vst [vmem:[#allocation104_spill] sm:$0xff] %v1880_v54  ;;  %v1886_v36 = vsub.f32 0.0, %v3249_v43  ;;  %v1158_v40 = vpop.eup %1157  ;;  %v3256_v43 = vmax.f32 %v1843_v27, -100.0  ;;  %v3258_v11 = vmax.f32 %v1845_v37, -100.0 }
  0x82   :  { %3251 = vst [vmem:[#allocation106_spill] sm:$0xff] %v1888_v10  ;;  %3252 = vst [vmem:[#allocation107_spill] sm:$0xff] %v1893_v52  ;;  %v1897_v41 = vsub.f32 0.0, %v3253_v48  ;;  %v1160_v1 = vpop.eup %1159  ;;  %v1910_v28 = vmul.f32 0.6931472, %v1152_v31  ;;  %v3261_v48 = vmax.f32 %v1850_v35, -100.0 }
  0x83   :  { %3250 = vst [vmem:[#allocation105_spill] sm:$0xff] %v1886_v36  ;;  %3255 = vst [vmem:[#allocation109_spill] sm:$0xff] %v1899_v3  ;;  %v1904_v36 = vsub.f32 0.0, %v3256_v43  ;;  %v1908_v15 = vsub.f32 0.0, %v3258_v11  ;;  %v1162_v60 = vpop.eup %1161  ;;  %v1918_v23 = vmul.f32 0.6931472, %v1154_v55 }
  0x84   :  { %3254 = vst [vmem:[#allocation108_spill] sm:$0xff] %v1897_v41  ;;  %3260 = vst [vmem:[#allocation112_spill] sm:$0xff] %v1910_v28  ;;  %v1915_v41 = vsub.f32 0.0, %v3261_v48  ;;  %v430_v31 = vsub.f32 1.0, %v1535_v38  ;;  %v1926_v37 = vmul.f32 0.6931472, %v1156_v53 }
  0x85   :  { %3257 = vst [vmem:[#allocation110_spill] sm:$0xff] %v1904_v36  ;;  %3259 = vst [vmem:[#allocation111_spill] sm:$0xff] %v1908_v15  ;;  %v3264_v36 = vmax.f32 %v1861_v58, -100.0  ;;  %v1164_v15 = vpop.eup %1163  ;;  %v3267_v48 = vmax.f32 %v1872_v59, -100.0  ;;  %v431_v55 = vsub.f32 1.0, %v1541_v62  ;;  %v432_v53 = vsub.f32 1.0, %v1566_v25 }
  0x86   :  { %3262 = vst [vmem:[#allocation113_spill] sm:$0xff] %v1915_v41  ;;  %3263 = vst [vmem:[#allocation114_spill] sm:$0xff] %v1918_v23  ;;  %v1166_v42 = vpop.eup %1165  ;;  %v1934_v35 = vmul.f32 0.6931472, %v1158_v40  ;;  %v1942_v38 = vmul.f32 0.6931472, %v1160_v1 }
  0x87   :  { %v1923_v11 = vsub.f32 0.0, %v3264_v36  ;;  %3266 = vst [vmem:[#allocation116_spill] sm:$0xff] %v1926_v37  ;;  %v1931_v41 = vsub.f32 0.0, %v3267_v48  ;;  %v3269_v36 = vmax.f32 %v1880_v54, -100.0  ;;  %v3271_v48 = vmax.f32 %v1888_v10, -100.0  ;;  %v3273_v62 = vld [vmem:[#allocation33_spill] sm:$0xff] }
  0x88   :  { %v433_v59 = vsub.f32 1.0, %v3273_v62  ;;  %v1950_v40 = vmul.f32 0.6931472, %v1162_v60  ;;  %v1952_v58 = vmul.f32 0.6931472, %v1164_v15  ;;  %v3041_v43 = vmax.f32 %v1918_v23, -100.0 }
  0x89   :  { %3265 = vst [vmem:[#allocation115_spill] sm:$0xff] %v1923_v11  ;;  %3268 = vst [vmem:[#allocation117_spill] sm:$0xff] %v1931_v41  ;;  %v1939_v11 = vsub.f32 0.0, %v3269_v36  ;;  %v1947_v41 = vsub.f32 0.0, %v3271_v48  ;;  %v434_v36 = vsub.f32 1.0, %v1581_v56  ;;  %v3274_v52 = vmax.f32 %v1899_v3, -100.0 }
  0x8a   :  { %v435_v48 = vsub.f32 1.0, %v1583_v30  ;;  %v3276_v60 = vmax.f32 %v1910_v28, -100.0  ;;  %v1971_v62 = vsub.f32 0.0, %v3041_v43  ;;  %v358_v1 = vmax.f32 %v1942_v38, -100.0  ;;  %v3294_v3 = vld [vmem:[#allocation19_spill] sm:$0xff] }
  0x8b   :  { %3270 = vst [vmem:[#allocation118_spill] sm:$0xff] %v1939_v11  ;;  %3272 = vst [vmem:[#allocation119_spill] sm:$0xff] %v1947_v41  ;;  %v1956_v11 = vmul.f32 0.6931472, %v1166_v42  ;;  %v1961_v25 = vsub.f32 0.0, %v3274_v52  ;;  %v357_v41 = vmax.f32 %v1934_v35, -100.0 }
  0x8c   :  { %v1967_v15 = vsub.f32 0.0, %v3276_v60  ;;  %3278 = vst [vmem:[#allocation122_spill] sm:$0xff] %v1971_v62  ;;  %v436_v42 = vsub.f32 1.0, %v1593_v33  ;;  %v3279_v56 = vmax.f32 %v1926_v37, -100.0  ;;  %v438_v35 = vsub.f32 1.0, %v1606_v18 }
  0x8d   :  { %3275 = vst [vmem:[#allocation120_spill] sm:$0xff] %v1961_v25  ;;  %v437_v25 = vsub.f32 1.0, %v1604_v2  ;;  %v359_v30 = vmax.f32 %v1950_v40, -100.0  ;;  %v360_v60 = vmax.f32 %v1952_v58, -100.0  ;;  %v439_v43 = vsub.f32 1.0, %v1613_v61  ;;  %v3288_v61 = vld [vmem:[#allocation17_spill] sm:$0xff] }
  0x8e   :  { %3277 = vst [vmem:[#allocation121_spill] sm:$0xff] %v1967_v15  ;;  %v1977_v52 = vsub.f32 0.0, %v3279_v56  ;;  %v1983_v15 = vsub.f32 0.0, %v357_v41  ;;  %v361_v62 = vmax.f32 %v1956_v11, -100.0  ;;  %v1987_v33 = vsub.f32 0.0, %v358_v1  ;;  %v3283_v56 = vld [vmem:[#allocation48_spill] sm:$0xff] }
  0x8f   :  { %v440_v38 = vsub.f32 1.0, %v1624_v4  ;;  %v1991_v37 = vsub.f32 0.0, %v359_v30  ;;  %v1993_v2 = vsub.f32 0.0, %v360_v60  ;;  %v442_v40 = vsub.f32 1.0, %v1634_v57 }
  0x90   :  { %3280 = vst [vmem:[#allocation123_spill] sm:$0xff] %v1977_v52  ;;  %3281 = vst [vmem:[#allocation124_spill] sm:$0xff] %v1983_v15  ;;  %v441_v52 = vsub.f32 1.0, %v3283_v56  ;;  %v443_v58 = vsub.f32 1.0, %v1636_v44  ;;  %v1997_v18 = vsub.f32 0.0, %v361_v62  ;;  %v444_v15 = vsub.f32 1.0, %v1646_v50 }
  0x91   :  { %3282 = vst [vmem:[#allocation125_spill] sm:$0xff] %v1987_v33  ;;  %3284 = vst [vmem:[#allocation126_spill] sm:$0xff] %v1991_v37  ;;  %v445_v11 = vsub.f32 1.0, %v1648_v14  ;;  %v446_v33 = vsub.f32 1.0, %v1668_v7  ;;  %v447_v4 = vsub.f32 1.0, %v1672_v47  ;;  %v448_v56 = vsub.f32 1.0, %v1679_v24 }
  0x92   :  { %3285 = vst [vmem:[#allocation127_spill] sm:$0xff] %v1993_v2  ;;  %3286 = vst [vmem:[#allocation128_spill] sm:$0xff] %v1997_v18  ;;  %v449_v37 = vsub.f32 1.0, %v1686_v6  ;;  %v450_v2 = vsub.f32 1.0, %v1693_v51  ;;  %v451_v57 = vsub.f32 1.0, %v1700_v8  ;;  %v452_v44 = vsub.f32 1.0, %v1709_v32 }
  0x93   :  { %v453_v18 = vsub.f32 1.0, %v1711_v21  ;;  %v454_v50 = vsub.f32 1.0, %v1720_v22  ;;  %v455_v14 = vsub.f32 1.0, %v1722_v46  ;;  %v456_v7 = vsub.f32 1.0, %v1734_v20  ;;  %v3291_v8 = vld [vmem:[#allocation18_spill] sm:$0xff] }
  0x94   :  { %v457_v47 = vsub.f32 1.0, %v1746_v0  ;;  %v3287_v24 = vmax.f32 %v1702_v17, -100.0  ;;  %v3289_v6 = vsub.f32 1.0, %v3288_v61  ;;  %v3290_v51 = vmax.f32 %v1713_v9, -100.0 }
  0x95   :  { %v3292_v28 = vsub.f32 1.0, %v3291_v8  ;;  %v3293_v21 = vmax.f32 %v1724_v45, -100.0  ;;  %v3295_v22 = vsub.f32 1.0, %v3294_v3  ;;  %v3296_v46 = vmax.f32 %v1736_v39, -100.0 }
  0x96   :  { %v458_v23 = vmul.f32 %v3289_v6, %v3287_v24  ;;  %v3297_v20 = vsub.f32 1.0, %v1501_v26  ;;  %v3298_v17 = vmax.f32 %v1748_v13, -100.0  ;;  %v3299_v61 = vmax.f32 %v1756_v49, -100.0  ;;  %v3306_v49 = vld [vmem:[#allocation90_spill] sm:$0xff] }
  0x97   :  { %v459_v32 = vmul.f32 %v3292_v28, %v3290_v51  ;;  %v460_v10 = vmul.f32 %v3295_v22, %v3293_v21  ;;  %v3300_v6 = vmax.f32 %v1764_v63, -100.0  ;;  %v3301_v51 = vmax.f32 %v1773_v34, -100.0  ;;  %v3309_v34 = vld [vmem:[#allocation93_spill] sm:$0xff] }
  0x98   :  { %v461_v0 = vmul.f32 %v3297_v20, %v3296_v46  ;;  %v462_v54 = vmul.f32 %v430_v31, %v3298_v17  ;;  %v463_v24 = vmul.f32 %v431_v55, %v3299_v61  ;;  %v3302_v45 = vmax.f32 %v1782_v29, -100.0  ;;  %v3311_v29 = vld [vmem:[#allocation94_spill] sm:$0xff] }
  0x99   :  { %v464_v8 = vmul.f32 %v432_v53, %v3300_v6  ;;  %v465_v9 = vmul.f32 %v433_v59, %v3301_v51  ;;  %v3303_v22 = vmax.f32 %v1791_v12, -100.0  ;;  %v3304_v26 = vmax.f32 %v1800_v5, -100.0  ;;  %v3314_v5 = vld [vmem:[#allocation95_spill] sm:$0xff] }
  0x9a   :  { %v466_v21 = vmul.f32 %v434_v36, %v3302_v45  ;;  %v3305_v13 = vmax.f32 %v1809_v19, -100.0  ;;  %v3307_v3 = vmax.f32 %v3306_v49, -100.0  ;;  %v3308_v63 = vmax.f32 %v1827_v16, -100.0  ;;  %v3316_v19 = vld [vmem:[#allocation96_spill] sm:$0xff]  ;;  %v3318_v6 = vld [vmem:[#allocation99_spill] sm:$0xff]  ;;  %v3320_v16 = vld [vmem:[#allocation102_spill] sm:$0xff] }
  0x9b   :  { %v467_v39 = vmul.f32 %v435_v48, %v3303_v22  ;;  %v468_v46 = vmul.f32 %v436_v42, %v3304_v26  ;;  %v3310_v59 = vmax.f32 %v3309_v34, -100.0  ;;  %v3312_v53 = vmax.f32 %v3311_v29, -100.0  ;;  %v3322_v22 = vld [vmem:[#allocation104_spill] sm:$0xff] }
  0x9c   :  { %v469_v20 = vmul.f32 %v437_v25, %v3305_v13  ;;  %v470_v28 = vmul.f32 %v438_v35, %v3307_v3  ;;  %v471_v31 = vmul.f32 %v439_v43, %v3308_v63  ;;  %v3313_v12 = vmax.f32 %v1843_v27, -100.0  ;;  %v3324_v13 = vld [vmem:[#allocation106_spill] sm:$0xff]  ;;  %v3326_v27 = vld [vmem:[#allocation109_spill] sm:$0xff]  ;;  %v3328_v63 = vld [vmem:[#allocation112_spill] sm:$0xff] }
  0x9d   :  { %v472_v55 = vmul.f32 %v440_v38, %v3310_v59  ;;  %v473_v36 = vmul.f32 %v441_v52, %v3312_v53  ;;  %v3315_v42 = vmax.f32 %v3314_v5, -100.0  ;;  %v3317_v25 = vmax.f32 %v3316_v19, -100.0  ;;  %v3330_v59 = vld [vmem:[#allocation114_spill] sm:$0xff]  ;;  %v3332_v53 = vld [vmem:[#allocation116_spill] sm:$0xff] }
  0x9e   :  { %v474_v48 = vmul.f32 %v442_v40, %v3313_v12  ;;  %v3319_v35 = vmax.f32 %v3318_v6, -100.0  ;;  %v3321_v43 = vmax.f32 %v3320_v16, -100.0  ;;  %v3323_v38 = vmax.f32 %v3322_v22, -100.0 }
  0x9f   :  { %v475_v17 = vmul.f32 %v443_v58, %v3315_v42  ;;  %v476_v61 = vmul.f32 %v444_v15, %v3317_v25  ;;  %v3325_v52 = vmax.f32 %v3324_v13, -100.0  ;;  %v3327_v40 = vmax.f32 %v3326_v27, -100.0  ;;  %v3334_v25 = vld [vmem:[#allocation24_spill] sm:$0xff] }
  0xa0   :  { %v477_v51 = vmul.f32 %v445_v11, %v3319_v35  ;;  %v478_v45 = vmul.f32 %v446_v33, %v3321_v43  ;;  %v479_v26 = vmul.f32 %v447_v4, %v3323_v38  ;;  %v3329_v58 = vmax.f32 %v3328_v63, -100.0 }
  0xa1   :  { %v480_v49 = vmul.f32 %v448_v56, %v3325_v52  ;;  %v481_v3 = vmul.f32 %v449_v37, %v3327_v40  ;;  %v3331_v15 = vmax.f32 %v3330_v59, -100.0  ;;  %v3333_v11 = vmax.f32 %v3332_v53, -100.0  ;;  %v3335_v56 = vld [vmem:[#allocation25_spill] sm:$0xff]  ;;  %v3336_v37 = vld [vmem:[#allocation26_spill] sm:$0xff] }
  0xa2   :  { %v482_v34 = vmul.f32 %v450_v2, %v3329_v58  ;;  %v485_v5 = vmul.f32 %v453_v18, %v357_v41  ;;  %v486_v33 = vmul.f32 %v454_v50, %v358_v1  ;;  %v487_v42 = vmul.f32 %v455_v14, %v359_v30  ;;  %v3337_v2 = vld [vmem:[#allocation27_spill] sm:$0xff]  ;;  %v3340_v30 = vld [vmem:[#allocation34_spill] sm:$0xff] }
  0xa3   :  { %v483_v29 = vmul.f32 %v451_v57, %v3331_v15  ;;  %v484_v12 = vmul.f32 %v452_v44, %v3333_v11  ;;  %v488_v19 = vmul.f32 %v456_v7, %v360_v60  ;;  %v489_v4 = vmul.f32 %v457_v47, %v361_v62  ;;  %v3338_v57 = vld [vmem:[#allocation30_spill] sm:$0xff]  ;;  %v3339_v18 = vld [vmem:[#allocation31_spill] sm:$0xff]  ;;  %v3341_v47 = vld [vmem:[#allocation37_spill] sm:$0xff] }
  0xa4   :  { %v2076_v6 = vadd.f32 %v458_v23, %v3334_v25  ;;  %v2079_v35 = vadd.f32 %v459_v32, %v3335_v56  ;;  %v2082_v16 = vadd.f32 %v460_v10, %v3336_v37  ;;  %v2085_v43 = vadd.f32 %v461_v0, %v3337_v2  ;;  %v3342_v14 = vld [vmem:[#allocation39_spill] sm:$0xff]  ;;  %v3343_v10 = vld [vmem:[#allocation40_spill] sm:$0xff]  ;;  %v3346_v1 = vld [vmem:[#allocation46_spill] sm:$0xff] }
  0xa5   :  { %v2088_v22 = vadd.f32 %v462_v54, %v3338_v57  ;;  %v2091_v44 = vadd.f32 %v463_v24, %v3339_v18  ;;  %v2094_v62 = vadd.f32 %v464_v8, %v3340_v30  ;;  %v2097_v50 = vadd.f32 %v465_v9, %v3341_v47  ;;  %v3344_v0 = vld [vmem:[#allocation43_spill] sm:$0xff]  ;;  %v3345_v54 = vld [vmem:[#allocation45_spill] sm:$0xff]  ;;  %v3349_v9 = vld [vmem:[#allocation52_spill] sm:$0xff] }
  0xa6   :  { %v2100_v7 = vadd.f32 %v466_v21, %v3342_v14  ;;  %v2103_v32 = vadd.f32 %v467_v39, %v3343_v10  ;;  %v2106_v23 = vadd.f32 %v468_v46, %v3344_v0  ;;  %v2109_v41 = vadd.f32 %v469_v20, %v3345_v54  ;;  %v3347_v24 = vld [vmem:[#allocation49_spill] sm:$0xff]  ;;  %v3353_v39 = vld [vmem:[#allocation56_spill] sm:$0xff]  ;;  %v3357_v20 = vld [vmem:[#allocation58_spill] sm:$0xff] }
  0xa7   :  { %v2112_v60 = vadd.f32 %v470_v28, %v3346_v1  ;;  %v2115_v8 = vadd.f32 %v471_v31, %v3347_v24  ;;  %v2118_v38 = vadd.f32 %v472_v55, %v3349_v9  ;;  %v3351_v21 = vld [vmem:[#allocation53_spill] sm:$0xff]  ;;  %v2124_v52 = vadd.f32 %v474_v48, %v3353_v39  ;;  %v3359_v28 = vld [vmem:[#allocation59_spill] sm:$0xff]  ;;  %v3361_v31 = vld [vmem:[#allocation62_spill] sm:$0xff] }
  0xa8   :  { %v2121_v13 = vadd.f32 %v473_v36, %v3351_v21  ;;  %v3355_v46 = vld [vmem:[#allocation57_spill] sm:$0xff]  ;;  %v2130_v40 = vadd.f32 %v476_v61, %v3357_v20  ;;  %v2133_v63 = vadd.f32 %v477_v51, %v3359_v28  ;;  %v2136_v58 = vadd.f32 %v478_v45, %v3361_v31  ;;  %v3363_v55 = vld [vmem:[#allocation64_spill] sm:$0xff]  ;;  %v3365_v36 = vld [vmem:[#allocation66_spill] sm:$0xff] }
  0xa9   :  { %3348 = vst [vmem:[#allocation17_spill] sm:$0xff] %v2115_v8  ;;  %3350 = vst [vmem:[#allocation18_spill] sm:$0xff] %v2118_v38  ;;  %v2127_v27 = vadd.f32 %v475_v17, %v3355_v46  ;;  %v2139_v59 = vadd.f32 %v479_v26, %v3363_v55  ;;  %v2142_v15 = vadd.f32 %v480_v49, %v3365_v36  ;;  %v3367_v48 = vld [vmem:[#allocation68_spill] sm:$0xff]  ;;  %v3369_v17 = vld [vmem:[#allocation70_spill] sm:$0xff] }
  0xaa   :  { %3352 = vst [vmem:[#allocation19_spill] sm:$0xff] %v2121_v13  ;;  %3354 = vst [vmem:[#allocation90_spill] sm:$0xff] %v2124_v52  ;;  %v2145_v53 = vadd.f32 %v481_v3, %v3367_v48  ;;  %v2148_v11 = vadd.f32 %v482_v34, %v3369_v17  ;;  %v3371_v61 = vld [vmem:[#allocation73_spill] sm:$0xff]  ;;  %v3373_v51 = vld [vmem:[#allocation76_spill] sm:$0xff] }
  0xab   :  { %3356 = vst [vmem:[#allocation93_spill] sm:$0xff] %v2127_v27  ;;  %3358 = vst [vmem:[#allocation94_spill] sm:$0xff] %v2130_v40  ;;  %v2151_v25 = vadd.f32 %v483_v29, %v3371_v61  ;;  %v2154_v56 = vadd.f32 %v484_v12, %v3373_v51  ;;  %v3375_v45 = vld [vmem:[#allocation77_spill] sm:$0xff]  ;;  %v3377_v26 = vld [vmem:[#allocation79_spill] sm:$0xff] }
  0xac   :  { %3360 = vst [vmem:[#allocation95_spill] sm:$0xff] %v2133_v63  ;;  %3362 = vst [vmem:[#allocation96_spill] sm:$0xff] %v2136_v58  ;;  %v2157_v37 = vadd.f32 %v485_v5, %v3375_v45  ;;  %v2160_v2 = vadd.f32 %v486_v33, %v3377_v26  ;;  %v3379_v49 = vld [vmem:[#allocation80_spill] sm:$0xff]  ;;  %v3381_v3 = vld [vmem:[#allocation82_spill] sm:$0xff] }
  0xad   :  { %3364 = vst [vmem:[#allocation99_spill] sm:$0xff] %v2139_v59  ;;  %3366 = vst [vmem:[#allocation102_spill] sm:$0xff] %v2142_v15  ;;  %v2163_v57 = vadd.f32 %v487_v42, %v3379_v49  ;;  %v2166_v18 = vadd.f32 %v488_v19, %v3381_v3  ;;  %v3383_v34 = vld [vmem:[#allocation83_spill] sm:$0xff]  ;;  %v3386_v48 = vld [vmem:[#allocation28_spill] sm:$0xff] }
  0xae   :  { %3368 = vst [vmem:[#allocation104_spill] sm:$0xff] %v2145_v53  ;;  %3370 = vst [vmem:[#allocation106_spill] sm:$0xff] %v2148_v11  ;;  %v2169_v30 = vadd.f32 %v489_v4, %v3383_v34  ;;  %v2203_v55 = vld [vmem:[#allocation2 + $0x20] sm:$0xff]  ;;  %v2207_v17 = vld [vmem:[#allocation2 + $0x28] sm:$0xff] }
  0xaf   :  { %3372 = vst [vmem:[#allocation109_spill] sm:$0xff] %v2151_v25  ;;  %3374 = vst [vmem:[#allocation112_spill] sm:$0xff] %v2154_v56  ;;  %v558_v36 = vsub.f32 %v3386_v48, %v2203_v55  ;;  %v3388_v61 = vld [vmem:[#allocation29_spill] sm:$0xff]  ;;  %v3390_v26 = vld [vmem:[#allocation32_spill] sm:$0xff] }
  0xb0   :  { %3376 = vst [vmem:[#allocation114_spill] sm:$0xff] %v2157_v37  ;;  %3378 = vst [vmem:[#allocation116_spill] sm:$0xff] %v2160_v2  ;;  %v559_v51 = vsub.f32 %v3388_v61, %v2207_v17  ;;  %v2211_v31 = vld [vmem:[#allocation2 + $0x30] sm:$0xff]  ;;  %v2215_v49 = vld [vmem:[#allocation2 + $0x38] sm:$0xff] }
  0xb1   :  { %3380 = vst [vmem:[#allocation24_spill] sm:$0xff] %v2163_v57  ;;  %3382 = vst [vmem:[#allocation25_spill] sm:$0xff] %v2166_v18  ;;  %v560_v45 = vsub.f32 %v3390_v26, %v2211_v31  ;;  %v3392_v3 = vld [vmem:[#allocation33_spill] sm:$0xff]  ;;  %v2219_v28 = vld [vmem:[#allocation2 + $0x40] sm:$0xff] }
  0xb2   :  { %3384 = vst [vmem:[#allocation26_spill] sm:$0xff] %v2169_v30  ;;  %3385 = vst [vmem:[#allocation27_spill] sm:$0xff] %v2203_v55  ;;  %v561_v34 = vsub.f32 %v3392_v3, %v2215_v49  ;;  %v3394_v20 = vld [vmem:[#allocation35_spill] sm:$0xff]  ;;  %v2223_v46 = vld [vmem:[#allocation2 + $0x48] sm:$0xff] }
  0xb3   :  { %3387 = vst [vmem:[#allocation30_spill] sm:$0xff] %v2207_v17  ;;  %3389 = vst [vmem:[#allocation31_spill] sm:$0xff] %v2211_v31  ;;  %v562_v48 = vsub.f32 %v3394_v20, %v2219_v28  ;;  %v3396_v39 = vld [vmem:[#allocation36_spill] sm:$0xff]  ;;  %v2227_v21 = vld [vmem:[#allocation2 + $0x50] sm:$0xff]  ;;  %v592_v59 = vmul.f32 %v560_v45, %v560_v45 }
  0xb4   :  { %3391 = vst [vmem:[#allocation34_spill] sm:$0xff] %v2215_v49  ;;  %3393 = vst [vmem:[#allocation37_spill] sm:$0xff] %v2219_v28  ;;  %v563_v61 = vsub.f32 %v3396_v39, %v2223_v46  ;;  %v3398_v9 = vld [vmem:[#allocation38_spill] sm:$0xff]  ;;  %v3400_v1 = vld [vmem:[#allocation41_spill] sm:$0xff] }
  0xb5   :  { %3395 = vst [vmem:[#allocation39_spill] sm:$0xff] %v2223_v46  ;;  %3397 = vst [vmem:[#allocation40_spill] sm:$0xff] %v2227_v21  ;;  %v564_v26 = vsub.f32 %v3398_v9, %v2227_v21  ;;  %v2231_v24 = vld [vmem:[#allocation2 + $0x58] sm:$0xff]  ;;  %v2235_v54 = vld [vmem:[#allocation2 + $0x60] sm:$0xff] }
  0xb6   :  { %3399 = vst [vmem:[#allocation43_spill] sm:$0xff] %v2231_v24  ;;  %v565_v3 = vsub.f32 %v3400_v1, %v2231_v24  ;;  %3401 = vst [vmem:[#allocation45_spill] sm:$0xff] %v2235_v54  ;;  %v3402_v0 = vld [vmem:[#allocation42_spill] sm:$0xff]  ;;  %v2239_v4 = vld [vmem:[#allocation2 + $0x68] sm:$0xff]  ;;  %v595_v58 = vmul.f32 %v563_v61, %v563_v61 }
  0xb7   :  { %v566_v20 = vsub.f32 %v3402_v0, %v2235_v54  ;;  %3403 = vst [vmem:[#allocation46_spill] sm:$0xff] %v2239_v4  ;;  %v3404_v10 = vld [vmem:[#allocation44_spill] sm:$0xff]  ;;  %v2243_v19 = vld [vmem:[#allocation2 + $0x70] sm:$0xff]  ;;  %v3406_v42 = vld [vmem:[#allocation47_spill] sm:$0xff] }
  0xb8   :  { %v567_v39 = vsub.f32 %v3404_v10, %v2239_v4  ;;  %3405 = vst [vmem:[#allocation49_spill] sm:$0xff] %v2243_v19  ;;  %v568_v9 = vsub.f32 %v3406_v42, %v2243_v19  ;;  %v2247_v14 = vld [vmem:[#allocation2 + $0x78] sm:$0xff]  ;;  %v3408_v33 = vld [vmem:[#allocation48_spill] sm:$0xff]  ;;  %v2259_v30 = vld [vmem:[#allocation2 + $0x90] sm:$0xff] }
  0xb9   :  { %3407 = vst [vmem:[#allocation52_spill] sm:$0xff] %v2247_v14  ;;  %v569_v1 = vsub.f32 %v3408_v33, %v2247_v14  ;;  %v2251_v5 = vld [vmem:[#allocation2 + $0x80] sm:$0xff]  ;;  %v3410_v47 = vld [vmem:[#allocation50_spill] sm:$0xff]  ;;  %v2255_v12 = vld [vmem:[#allocation2 + $0x88] sm:$0xff] }
  0xba   :  { %3409 = vst [vmem:[#allocation53_spill] sm:$0xff] %v2251_v5  ;;  %v570_v0 = vsub.f32 %v3410_v47, %v2251_v5  ;;  %3411 = vst [vmem:[#allocation56_spill] sm:$0xff] %v2255_v12  ;;  %v3412_v29 = vld [vmem:[#allocation51_spill] sm:$0xff]  ;;  %v3414_v18 = vld [vmem:[#allocation54_spill] sm:$0xff]  ;;  %v599_v63 = vmul.f32 %v567_v39, %v567_v39 }
  0xbb   :  { %v571_v10 = vsub.f32 %v3412_v29, %v2255_v12  ;;  %3413 = vst [vmem:[#allocation57_spill] sm:$0xff] %v2259_v30  ;;  %v572_v42 = vsub.f32 %v3414_v18, %v2259_v30  ;;  %v2263_v57 = vld [vmem:[#allocation2 + $0x98] sm:$0xff]  ;;  %v2267_v14 = vld [vmem:[#allocation2 + $0xa0] sm:$0xff]  ;;  %v2271_v5 = vld [vmem:[#allocation2 + $0xa8] sm:$0xff]  ;;  %v601_v40 = vmul.f32 %v569_v1, %v569_v1 }
  0xbc   :  { %3415 = vst [vmem:[#allocation58_spill] sm:$0xff] %v2263_v57  ;;  %v3416_v2 = vld [vmem:[#allocation55_spill] sm:$0xff]  ;;  %3417 = vst [vmem:[#allocation59_spill] sm:$0xff] %v2267_v14  ;;  %v3418_v19 = vld [vmem:[#allocation60_spill] sm:$0xff]  ;;  %v602_v27 = vmul.f32 %v570_v0, %v570_v0  ;;  %v3451_v0 = vsub.f32 0.0, %v2082_v16  ;;  %v3456_v16 = vsub.f32 0.0, %v2097_v50 }
  0xbd   :  { %v573_v33 = vsub.f32 %v3416_v2, %v2263_v57  ;;  %v574_v47 = vsub.f32 %v3418_v19, %v2267_v14  ;;  %3419 = vst [vmem:[#allocation62_spill] sm:$0xff] %v2271_v5  ;;  %v3420_v4 = vld [vmem:[#allocation61_spill] sm:$0xff]  ;;  %v3422_v54 = vld [vmem:[#allocation63_spill] sm:$0xff]  ;;  %v3432_v49 = vld [vmem:[#allocation72_spill] sm:$0xff]  ;;  %v604_v52 = vmul.f32 %v572_v42, %v572_v42  ;;  %v3461_v50 = vsub.f32 0.0, %v2112_v60 }
  0xbe   :  { %v575_v29 = vsub.f32 %v3420_v4, %v2271_v5  ;;  %v2275_v12 = vld [vmem:[#allocation2 + $0xb0] sm:$0xff]  ;;  %v2279_v30 = vld [vmem:[#allocation2 + $0xb8] sm:$0xff]  ;;  %v2283_v57 = vld [vmem:[#allocation2 + $0xc0] sm:$0xff] }
  0xbf   :  { %3421 = vst [vmem:[#allocation64_spill] sm:$0xff] %v2275_v12  ;;  %v576_v18 = vsub.f32 %v3422_v54, %v2275_v12  ;;  %3423 = vst [vmem:[#allocation66_spill] sm:$0xff] %v2279_v30  ;;  %v3424_v24 = vld [vmem:[#allocation65_spill] sm:$0xff]  ;;  %v3426_v21 = vld [vmem:[#allocation67_spill] sm:$0xff]  ;;  %v605_v13 = vmul.f32 %v573_v33, %v573_v33 }
  0xc0   :  { %v577_v2 = vsub.f32 %v3424_v24, %v2279_v30  ;;  %3425 = vst [vmem:[#allocation68_spill] sm:$0xff] %v2283_v57  ;;  %v578_v19 = vsub.f32 %v3426_v21, %v2283_v57  ;;  %v2287_v14 = vld [vmem:[#allocation2 + $0xc8] sm:$0xff]  ;;  %v2291_v5 = vld [vmem:[#allocation2 + $0xd0] sm:$0xff]  ;;  %v3430_v28 = vld [vmem:[#allocation71_spill] sm:$0xff]  ;;  %v607_v38 = vmul.f32 %v575_v29, %v575_v29 }
  0xc1   :  { %3427 = vst [vmem:[#allocation70_spill] sm:$0xff] %v2287_v14  ;;  %v3428_v46 = vld [vmem:[#allocation69_spill] sm:$0xff]  ;;  %3429 = vst [vmem:[#allocation73_spill] sm:$0xff] %v2291_v5  ;;  %v580_v54 = vsub.f32 %v3430_v28, %v2291_v5  ;;  %v3431_v12 = vld [vmem:[#allocation12_spill] sm:$0xff]  ;;  %v608_v8 = vmul.f32 %v576_v18, %v576_v18 }
  0xc2   :  { %v579_v4 = vsub.f32 %v3428_v46, %v2287_v14  ;;  %v581_v31 = vsub.f32 %v3432_v49, %v3431_v12  ;;  %v3433_v17 = vld [vmem:[#allocation13_spill] sm:$0xff]  ;;  %v3434_v24 = vld [vmem:[#allocation74_spill] sm:$0xff]  ;;  %v3436_v37 = vld [vmem:[#allocation75_spill] sm:$0xff] }
  0xc3   :  { %v582_v30 = vsub.f32 %v3434_v24, %v3433_v17  ;;  %v3435_v55 = vld [vmem:[#allocation14_spill] sm:$0xff]  ;;  %v3437_v21 = vld [vmem:[#allocation15_spill] sm:$0xff]  ;;  %v3439_v11 = vld [vmem:[#allocation16_spill] sm:$0xff] }
  0xc4   :  { %v583_v56 = vsub.f32 %v3436_v37, %v3435_v55  ;;  %v3438_v57 = vld [vmem:[#allocation78_spill] sm:$0xff]  ;;  %v3440_v53 = vld [vmem:[#allocation81_spill] sm:$0xff]  ;;  %v3442_v14 = vld [vmem:[#allocation20_spill] sm:$0xff]  ;;  %v590_v37 = vmul.f32 %v558_v36, %v558_v36  ;;  %v591_v55 = vmul.f32 %v559_v51, %v559_v51  ;;  %v610_v36 = vmul.f32 %v578_v19, %v578_v19 }
  0xc5   :  { %v584_v25 = vsub.f32 %v3438_v57, %v3437_v21  ;;  %v2305_v46 = vsub.f32 %v3440_v53, %v3439_v11  ;;  %v586_v15 = vmul.f32 %v3442_v14, %v3442_v14  ;;  %v3443_v28 = vld [vmem:[#allocation21_spill] sm:$0xff]  ;;  %v3444_v12 = vld [vmem:[#allocation22_spill] sm:$0xff]  ;;  %v3445_v17 = vld [vmem:[#allocation23_spill] sm:$0xff]  ;;  %v593_v57 = vmul.f32 %v561_v34, %v561_v34 }
  0xc6   :  { %v587_v5 = vmul.f32 %v3443_v28, %v3443_v28  ;;  %v588_v49 = vmul.f32 %v3444_v12, %v3444_v12  ;;  %v589_v24 = vmul.f32 %v3445_v17, %v3445_v17  ;;  %v594_v21 = vmul.f32 %v562_v48, %v562_v48  ;;  %v2315_v51 = vld [vmem:[#allocation7] sm:$0xff] }
  0xc7   :  { %3441 = vst [vmem:[#allocation76_spill] sm:$0xff] %v2305_v46  ;;  %v596_v53 = vmul.f32 %v564_v26, %v564_v26  ;;  %v597_v11 = vmul.f32 %v565_v3, %v565_v3  ;;  %v598_v46 = vmul.f32 %v566_v20, %v566_v20  ;;  %v600_v14 = vmul.f32 %v568_v9, %v568_v9 }
  0xc8   :  { %v603_v28 = vmul.f32 %v571_v10, %v571_v10  ;;  %v606_v12 = vmul.f32 %v574_v47, %v574_v47  ;;  %v609_v17 = vmul.f32 %v577_v2, %v577_v2  ;;  %v611_v45 = vmul.f32 %v579_v4, %v579_v4  ;;  %v3462_v2 = vld [vmem:[#allocation17_spill] sm:$0xff]  ;;  %v3464_v4 = vld [vmem:[#allocation18_spill] sm:$0xff] }
  0xc9   :  { %v612_v34 = vmul.f32 %v580_v54, %v580_v54  ;;  %v613_v48 = vmul.f32 %v581_v31, %v581_v31  ;;  %v2317_v61 = vmul.f32 %v582_v30, %v582_v30  ;;  %v2319_v26 = vmul.f32 %v583_v56, %v583_v56  ;;  %v3466_v54 = vld [vmem:[#allocation19_spill] sm:$0xff] }
  0xca   :  { %v2321_v3 = vmul.f32 %v584_v25, %v584_v25  ;;  %v3449_v20 = vsub.f32 0.0, %v2076_v6  ;;  %v3450_v9 = vsub.f32 0.0, %v2079_v35  ;;  %v2333_v10 = vmul.f32 %v588_v49, %v3451_v0 }
  0xcb   :  { %3446 = vst [vmem:[#allocation77_spill] sm:$0xff] %v2317_v61  ;;  %3447 = vst [vmem:[#allocation79_spill] sm:$0xff] %v2319_v26  ;;  %v3452_v31 = vsub.f32 0.0, %v2085_v43  ;;  %v3453_v56 = vsub.f32 0.0, %v2088_v22  ;;  %v3454_v6 = vsub.f32 0.0, %v2091_v44  ;;  %vm130_vm0 = vnez %v2315_v51  ;;  %v3523_v26 = vld [vmem:[#allocation64_spill] sm:$0xff] }
  0xcc   :  { %3448 = vst [vmem:[#allocation80_spill] sm:$0xff] %v2321_v3  ;;  %v2325_v39 = vmul.f32 %v586_v15, %v3449_v20  ;;  %v2329_v1 = vmul.f32 %v587_v5, %v3450_v9  ;;  %v3455_v35 = vsub.f32 0.0, %v2094_v62  ;;  %v2354_v42 = vmul.f32 %v593_v57, %v3456_v16  ;;  %v2396_v57 = vld [vmem:[#allocation7 + $0x8] sm:$0xff]  ;;  %v3521_v3 = vld [vmem:[#allocation59_spill] sm:$0xff] }
  0xcd   :  { %v2337_v30 = vmul.f32 %v589_v24, %v3452_v31  ;;  %v2341_v25 = vmul.f32 %v590_v37, %v3453_v56  ;;  %v2345_v15 = vmul.f32 %v591_v55, %v3454_v6  ;;  %v3457_v43 = vsub.f32 0.0, %v2100_v7  ;;  %v3469_v24 = vld [vmem:[#allocation90_spill] sm:$0xff]  ;;  %v3472_v55 = vld [vmem:[#allocation93_spill] sm:$0xff]  ;;  %v3490_v16 = vld [vmem:[#allocation104_spill] sm:$0xff] }
  0xce   :  { %v2350_v5 = vmul.f32 %v592_v59, %v3455_v35  ;;  %v3458_v22 = vsub.f32 0.0, %v2103_v32  ;;  %v3459_v44 = vsub.f32 0.0, %v2106_v23  ;;  %v3460_v62 = vsub.f32 0.0, %v2109_v41 }
  0xcf   :  { %v2358_v33 = vmul.f32 %v594_v21, %v3457_v43  ;;  %v2374_v18 = vmul.f32 %v598_v46, %v3461_v50  ;;  %v3463_v7 = vsub.f32 0.0, %v3462_v2  ;;  %v3465_v32 = vsub.f32 0.0, %v3464_v4  ;;  %v2430_v2 = vld [vmem:[#allocation7 + $0x10] sm:$0xff] }
  0xd0   :  { %v2362_v47 = vmul.f32 %v595_v58, %v3458_v22  ;;  %v2366_v29 = vmul.f32 %v596_v53, %v3459_v44  ;;  %v2370_v59 = vmul.f32 %v597_v11, %v3460_v62  ;;  %v3467_v23 = vsub.f32 0.0, %v3466_v54  ;;  %v3478_v11 = vld [vmem:[#allocation95_spill] sm:$0xff]  ;;  %v3493_v22 = vld [vmem:[#allocation106_spill] sm:$0xff]  ;;  %v3496_v62 = vld [vmem:[#allocation109_spill] sm:$0xff] }
  0xd1   :  { %v2378_v19 = vmul.f32 %v599_v63, %v3463_v7  ;;  %v2382_v58 = vmul.f32 %v600_v14, %v3465_v32  ;;  %v3470_v41 = vsub.f32 0.0, %v3469_v24  ;;  %v3473_v60 = vsub.f32 0.0, %v3472_v55  ;;  %v3475_v63 = vld [vmem:[#allocation94_spill] sm:$0xff]  ;;  %v1191_v24 = vld [vmem:[#allocation2 + $0x8] sm:$0xff]  ;;  %v2442_v55 = vld [vmem:[#allocation7 + $0x20] sm:$0xff] }
  0xd2   :  { %v2386_v49 = vmul.f32 %v601_v40, %v3467_v23  ;;  %v3476_v21 = vsub.f32 0.0, %v3475_v63  ;;  %v3479_v14 = vsub.f32 0.0, %v3478_v11  ;;  %v3481_v40 = vld [vmem:[#allocation96_spill] sm:$0xff]  ;;  %v3491_v43 = vsub.f32 0.0, %v3490_v16  ;;  %v1193_v63 = vld [vmem:[#allocation2 + $0x18] sm:$0xff] }
  0xd3   :  { %v2390_v37 = vmul.f32 %v602_v27, %v3470_v41  ;;  %v2394_v46 = vmul.f32 %v603_v28, %v3473_v60  ;;  %v3482_v9 = vsub.f32 0.0, %v3481_v40  ;;  %v3484_v27 = vld [vmem:[#allocation99_spill] sm:$0xff]  ;;  %v3487_v28 = vld [vmem:[#allocation102_spill] sm:$0xff]  ;;  %v3494_v44 = vsub.f32 0.0, %v3493_v22  ;;  %v2449_v40 = vld [vmem:[#allocation7 + $0x28] sm:$0xff] }
  0xd4   :  { %3468 = vst [vmem:[#allocation82_spill] sm:$0xff] %v2386_v49  ;;  %v2400_v53 = vmul.f32 %v604_v52, %v3476_v21  ;;  %v2404_v20 = vmul.f32 %v605_v13, %v3479_v14  ;;  %v3485_v31 = vsub.f32 0.0, %v3484_v27  ;;  %v3488_v6 = vsub.f32 0.0, %v3487_v28  ;;  %v3506_v14 = vld [vmem:[#allocation30_spill] sm:$0xff] }
  0xd5   :  { %3471 = vst [vmem:[#allocation83_spill] sm:$0xff] %v2390_v37  ;;  %3474 = vst [vmem:[#allocation28_spill] sm:$0xff] %v2394_v46  ;;  %v2408_v0 = vmul.f32 %v606_v12, %v3482_v9  ;;  %v2420_v52 = vmul.f32 %v609_v17, %v3491_v43  ;;  %v2424_v13 = vmul.f32 %v610_v36, %v3494_v44  ;;  %v3497_v50 = vsub.f32 0.0, %v3496_v62  ;;  %v1190_v17 = vld [vmem:[#allocation2] sm:$0xff]  ;;  %v2440_v36 = vld [vmem:[#allocation7 + $0x18] sm:$0xff] }
  0xd6   :  { %3477 = vst [vmem:[#allocation29_spill] sm:$0xff] %v2400_v53  ;;  %3480 = vst [vmem:[#allocation32_spill] sm:$0xff] %v2404_v20  ;;  %v2412_v56 = vmul.f32 %v607_v38, %v3485_v31  ;;  %v2416_v35 = vmul.f32 %v608_v8, %v3488_v6  ;;  %v3499_v38 = vld [vmem:[#allocation112_spill] sm:$0xff]  ;;  %v3502_v8 = vld [vmem:[#allocation114_spill] sm:$0xff]  ;;  %v650_v23 = vmul.f32 %v1190_v17, %v1190_v17  ;;  %vm131_vm1 = vnez %v2396_v57 }
  0xd7   :  { %3483 = vst [vmem:[#allocation33_spill] sm:$0xff] %v2408_v0  ;;  %3492 = vst [vmem:[#allocation38_spill] sm:$0xff] %v2420_v52  ;;  %v2428_v12 = vmul.f32 %v611_v45, %v3497_v50  ;;  %v3500_v7 = vsub.f32 0.0, %v3499_v38  ;;  %v3503_v32 = vsub.f32 0.0, %v3502_v8  ;;  %v651_v41 = vmul.f32 %v1191_v24, %v1191_v24  ;;  %v1192_v45 = vld [vmem:[#allocation2 + $0x10] sm:$0xff]  ;;  %v2453_v27 = vld [vmem:[#allocation7 + $0x38] sm:$0xff] }
  0xd8   :  { %3486 = vst [vmem:[#allocation35_spill] sm:$0xff] %v2412_v56  ;;  %3489 = vst [vmem:[#allocation36_spill] sm:$0xff] %v2416_v35  ;;  %v652_v60 = vmul.f32 %v1192_v45, %v1192_v45  ;;  %v653_v21 = vmul.f32 %v1193_v63, %v1193_v63  ;;  %v2451_v9 = vld [vmem:[#allocation7 + $0x30] sm:$0xff]  ;;  %v3507_v31 = vld [vmem:[#allocation31_spill] sm:$0xff]  ;;  %vm132_vm2 = vnez %v2430_v2  ;;  %vm133_vm3 = vnez %v2440_v36 }
  0xd9   :  { %3495 = vst [vmem:[#allocation41_spill] sm:$0xff] %v2424_v13  ;;  %3498 = vst [vmem:[#allocation42_spill] sm:$0xff] %v2428_v12  ;;  %v2434_v4 = vmul.f32 %v612_v34, %v3500_v7  ;;  %v2438_v54 = vmul.f32 %v613_v48, %v3503_v32  ;;  %v3505_v34 = vld [vmem:[#allocation27_spill] sm:$0xff]  ;;  %v655_v48 = vmul.f32 %v3506_v14, %v3506_v14  ;;  %v3508_v6 = vld [vmem:[#allocation34_spill] sm:$0xff]  ;;  %vm134_vm4 = vnez %v2442_v55 }
  0xda   :  { %v654_v11 = vmul.f32 %v3505_v34, %v3505_v34  ;;  %v656_v28 = vmul.f32 %v3507_v31, %v3507_v31  ;;  %v657_v16 = vmul.f32 %v3508_v6, %v3508_v6  ;;  %v3509_v43 = vld [vmem:[#allocation37_spill] sm:$0xff]  ;;  %v3510_v44 = vld [vmem:[#allocation39_spill] sm:$0xff]  ;;  %v3511_v50 = vld [vmem:[#allocation40_spill] sm:$0xff]  ;;  %vm135_vm5 = vnez %v2449_v40 }
  0xdb   :  { %3501 = vst [vmem:[#allocation44_spill] sm:$0xff] %v2434_v4  ;;  %3504 = vst [vmem:[#allocation47_spill] sm:$0xff] %v2438_v54  ;;  %v658_v22 = vmul.f32 %v3509_v43, %v3509_v43  ;;  %v659_v62 = vmul.f32 %v3510_v44, %v3510_v44  ;;  %v660_v38 = vmul.f32 %v3511_v50, %v3511_v50  ;;  %v3512_v7 = vld [vmem:[#allocation43_spill] sm:$0xff]  ;;  %v3513_v32 = vld [vmem:[#allocation45_spill] sm:$0xff]  ;;  %vm136_vm6 = vnez %v2451_v9 }
  0xdc   :  { %v661_v8 = vmul.f32 %v3512_v7, %v3512_v7  ;;  %v662_v17 = vmul.f32 %v3513_v32, %v3513_v32  ;;  %v3514_v24 = vld [vmem:[#allocation46_spill] sm:$0xff]  ;;  %v3515_v63 = vld [vmem:[#allocation49_spill] sm:$0xff]  ;;  %v3516_v14 = vld [vmem:[#allocation52_spill] sm:$0xff]  ;;  %vm137_vm7 = vnez %v2453_v27 }
  0xdd   :  { %v663_v45 = vmul.f32 %v3514_v24, %v3514_v24  ;;  %v664_v34 = vmul.f32 %v3515_v63, %v3515_v63  ;;  %v665_v31 = vmul.f32 %v3516_v14, %v3516_v14  ;;  %v3517_v6 = vld [vmem:[#allocation53_spill] sm:$0xff]  ;;  %v3518_v44 = vld [vmem:[#allocation56_spill] sm:$0xff]  ;;  %v3520_v24 = vld [vmem:[#allocation58_spill] sm:$0xff]  ;;  %v670_v14 = vmul.f32 %v3521_v3, %v3521_v3 }
  0xde   :  { %v666_v43 = vmul.f32 %v3517_v6, %v3517_v6  ;;  %v667_v50 = vmul.f32 %v3518_v44, %v3518_v44  ;;  %v3519_v7 = vld [vmem:[#allocation57_spill] sm:$0xff]  ;;  %v669_v63 = vmul.f32 %v3520_v24, %v3520_v24  ;;  %v3522_v54 = vld [vmem:[#allocation62_spill] sm:$0xff]  ;;  %v672_v44 = vmul.f32 %v3523_v26, %v3523_v26  ;;  %v3526_v12 = vld [vmem:[#allocation68_spill] sm:$0xff] }
  0xdf   :  { %v668_v32 = vmul.f32 %v3519_v7, %v3519_v7  ;;  %v671_v6 = vmul.f32 %v3522_v54, %v3522_v54  ;;  %v3524_v4 = vld [vmem:[#allocation66_spill] sm:$0xff]  ;;  %v2501_v13 = vmul.f32 %v3526_v12, %v3526_v12  ;;  %v3111_v7 = vmov 0   ;;  %v3530_v54 = vld [vmem:[#allocation73_spill] sm:$0xff]  ;;  %v3532_v35 = vld [vmem:[#allocation84_spill] sm:$0xff] }
  0xe0   :  { %v2497_v61 = vmul.f32 %v3524_v4, %v3524_v4  ;;  %v714_v24 = vsel %vm130_vm0, 16843009, %v3111_v7  ;;  %v3528_v3 = vld [vmem:[#allocation70_spill] sm:$0xff]  ;;  %v2512_v26 = vmul.f32 %v3530_v54, %v3530_v54  ;;  %v2515_v4 = vmul.f32 %v650_v23, %v3532_v35  ;;  %v3533_v56 = vld [vmem:[#allocation85_spill] sm:$0xff]  ;;  %v3535_v0 = vld [vmem:[#allocation87_spill] sm:$0xff] }
  0xe1   :  { %3527 = vst [vmem:[#allocation50_spill] sm:$0xff] %v2501_v13  ;;  %v2508_v52 = vmul.f32 %v3528_v3, %v3528_v3  ;;  %v3534_v12 = vld [vmem:[#allocation86_spill] sm:$0xff]  ;;  %v2524_v51 = vmul.f32 %v653_v21, %v3535_v0  ;;  %v3536_v7 = vld [vmem:[#allocation88_spill] sm:$0xff]  ;;  %v3537_v3 = vld [vmem:[#allocation89_spill] sm:$0xff] }
  0xe2   :  { %3525 = vst [vmem:[#allocation48_spill] sm:$0xff] %v2497_v61  ;;  %3531 = vst [vmem:[#allocation54_spill] sm:$0xff] %v2512_v26  ;;  %v2518_v61 = vmul.f32 %v651_v41, %v3533_v56  ;;  %v2521_v13 = vmul.f32 %v652_v60, %v3534_v12  ;;  %v2527_v20 = vmul.f32 %v654_v11, %v3536_v7  ;;  %v3538_v54 = vld [vmem:[#allocation91_spill] sm:$0xff]  ;;  %v3539_v35 = vld [vmem:[#allocation92_spill] sm:$0xff]  ;;  %v722_v56 = vunpack.c.0.s8 %v714_v24 }
  0xe3   :  { %3529 = vst [vmem:[#allocation51_spill] sm:$0xff] %v2508_v52  ;;  %v2530_v52 = vmul.f32 %v655_v48, %v3537_v3  ;;  %v2533_v26 = vmul.f32 %v656_v28, %v3538_v54  ;;  %v2536_v23 = vmul.f32 %v657_v16, %v3539_v35  ;;  %v723_v41 = vunpack.c.1.s8 %v714_v24  ;;  %v3540_v53 = vld [vmem:[#allocation97_spill] sm:$0xff]  ;;  %v3541_v12 = vld [vmem:[#allocation98_spill] sm:$0xff]  ;;  %v3542_v21 = vld [vmem:[#allocation100_spill] sm:$0xff] }
  0xe4   :  { %v2539_v60 = vmul.f32 %v658_v22, %v3540_v53  ;;  %v2542_v0 = vmul.f32 %v659_v62, %v3541_v12  ;;  %v2545_v11 = vmul.f32 %v660_v38, %v3542_v21  ;;  %v3543_v7 = vld [vmem:[#allocation101_spill] sm:$0xff]  ;;  %v3544_v3 = vld [vmem:[#allocation103_spill] sm:$0xff]  ;;  %v724_v53 = vunpack.c.2.s8 %v714_v24  ;;  %v3547_v22 = vld [vmem:[#allocation108_spill] sm:$0xff] }
  0xe5   :  { %v2548_v48 = vmul.f32 %v661_v8, %v3543_v7  ;;  %v2551_v28 = vmul.f32 %v662_v17, %v3544_v3  ;;  %v3545_v54 = vld [vmem:[#allocation105_spill] sm:$0xff]  ;;  %v3546_v35 = vld [vmem:[#allocation107_spill] sm:$0xff]  ;;  %v2560_v37 = vmul.f32 %v665_v31, %v3547_v22  ;;  %v3548_v62 = vld [vmem:[#allocation110_spill] sm:$0xff]  ;;  %v3550_v8 = vmov 0  }
  0xe6   :  { %v2554_v16 = vmul.f32 %v663_v45, %v3545_v54  ;;  %v2557_v46 = vmul.f32 %v664_v34, %v3546_v35  ;;  %v2563_v12 = vmul.f32 %v666_v43, %v3548_v62  ;;  %v3549_v38 = vld [vmem:[#allocation111_spill] sm:$0xff]  ;;  %v715_v17 = vsel %vm131_vm1, 16843009, %v3550_v8  ;;  %v3551_v7 = vld [vmem:[#allocation113_spill] sm:$0xff]  ;;  %v3557_v43 = vld [vmem:[#allocation118_spill] sm:$0xff] }
  0xe7   :  { %v2566_v21 = vmul.f32 %v667_v50, %v3549_v38  ;;  %v2572_v45 = vmul.f32 %v668_v32, %v3551_v7  ;;  %v725_v3 = vunpack.c.3.s8 %v714_v24  ;;  %v754_v34 = vpack.c.b16 %v722_v56, %v722_v56  ;;  %v3553_v35 = vld [vmem:[#allocation115_spill] sm:$0xff]  ;;  %v3555_v31 = vld [vmem:[#allocation117_spill] sm:$0xff] }
  0xe8   :  { %v756_v54 = vpack.c.b16 %v723_v41, %v723_v41  ;;  %v2575_v49 = vmul.f32 %v669_v63, %v3553_v35  ;;  %v2578_v22 = vmul.f32 %v670_v14, %v3555_v31  ;;  %v2581_v62 = vmul.f32 %v671_v6, %v3557_v43  ;;  %v3559_v24 = vld [vmem:[#allocation119_spill] sm:$0xff] }
  0xe9   :  { %3552 = vst [vmem:[#allocation55_spill] sm:$0xff] %v2572_v45  ;;  %v2586_v57 = vsel %vm132_vm2, 16843009, %v3550_v8  ;;  %v2591_v50 = vsel %vm133_vm3, 16843009, %v3550_v8  ;;  %v726_v63 = vunpack.c.0.s8 %v715_v17  ;;  %v758_v14 = vpack.c.b16 %v724_v53, %v724_v53 }
  0xea   :  { %3554 = vst [vmem:[#allocation60_spill] sm:$0xff] %v2575_v49  ;;  %3556 = vst [vmem:[#allocation61_spill] sm:$0xff] %v2578_v22  ;;  %v2596_v32 = vsel %vm134_vm4, 16843009, %v3550_v8  ;;  %v2599_v6 = vmul.f32 %v672_v44, %v3559_v24  ;;  %v2604_v2 = vsel %vm135_vm5, 16843009, %v3550_v8  ;;  %v727_v56 = vunpack.c.1.s8 %v715_v17 }
  0xeb   :  { %3558 = vst [vmem:[#allocation63_spill] sm:$0xff] %v2581_v62  ;;  %v2609_v36 = vsel %vm136_vm6, 16843009, %v3550_v8  ;;  %v2614_v55 = vsel %vm137_vm7, 16843009, %v3550_v8  ;;  %v755_v41 = vpack.c.b8 %v754_v34, %v754_v34  ;;  %v757_v53 = vpack.c.b8 %v756_v54, %v756_v54 }
  0xec   :  { %3560 = vst [vmem:[#allocation65_spill] sm:$0xff] %v2599_v6  ;;  %v760_v44 = vpack.c.b16 %v725_v3, %v725_v3  ;;  %v728_v38 = vunpack.c.2.s8 %v715_v17  ;;  %v729_v7 = vunpack.c.3.s8 %v715_v17  ;;  %v730_v40 = vunpack.c.0.s8 %v2586_v57 }
  0xed   :  { %v731_v35 = vunpack.c.1.s8 %v2586_v57  ;;  %v732_v31 = vunpack.c.2.s8 %v2586_v57  ;;  %v733_v9 = vunpack.c.3.s8 %v2586_v57  ;;  %v759_v43 = vpack.c.b8 %v758_v14, %v758_v14 }
  0xee   :  { %v762_v24 = vpack.c.b16 %v726_v63, %v726_v63  ;;  %v734_v27 = vunpack.c.0.s8 %v2591_v50  ;;  %v761_v54 = vpack.c.b8 %v760_v44, %v760_v44  ;;  %v764_v17 = vpack.c.b16 %v727_v56, %v727_v56 }
  0xef   :  { %vm818_vm8 = vnez %v755_v41  ;;  %vm819_vm9 = vnez %v757_v53  ;;  %v766_v6 = vpack.c.b16 %v728_v38, %v728_v38  ;;  %vm820_vm10 = vnez %v759_v43 }
  0xf0   :  { %v763_v49 = vpack.c.b8 %v762_v24, %v762_v24  ;;  %v850_v56 = vsel %vm818_vm8, 16843009, %v3550_v8  ;;  %v851_v41 = vsel %vm819_vm9, 16843009, %v3550_v8  ;;  %v765_v22 = vpack.c.b8 %v764_v17, %v764_v17 }
  0xf1   :  { %v768_v62 = vpack.c.b16 %v729_v7, %v729_v7  ;;  %vm821_vm11 = vnez %v761_v54  ;;  %v770_v24 = vpack.c.b16 %v730_v40, %v730_v40  ;;  %v852_v38 = vsel %vm820_vm10, 16843009, %v3550_v8 }
  0xf2   :  { %v767_v43 = vpack.c.b8 %v766_v6, %v766_v6  ;;  %vm822_vm12 = vnez %v763_v49  ;;  %v882_v34 = vunpack.c.0.s8 %v850_v56  ;;  %v883_v44 = vunpack.c.0.s8 %v851_v41 }
  0xf3   :  { %v748_v57 = vunpack.c.2.s8 %v2609_v36  ;;  %v749_v3 = vunpack.c.3.s8 %v2609_v36  ;;  %v750_v53 = vunpack.c.0.s8 %v2614_v55  ;;  %v853_v7 = vsel %vm821_vm11, 16843009, %v3550_v8 }
  0xf4   :  { %v769_v54 = vpack.c.b8 %v768_v62, %v768_v62  ;;  %v772_v17 = vpack.c.b16 %v731_v35, %v731_v35  ;;  %vm823_vm13 = vnez %v765_v22  ;;  %v884_v63 = vunpack.c.0.s8 %v852_v38 }
  0xf5   :  { %v751_v40 = vunpack.c.1.s8 %v2614_v55  ;;  %v771_v14 = vpack.c.b8 %v770_v24, %v770_v24  ;;  %v774_v45 = vpack.c.b16 %v732_v31, %v732_v31  ;;  %v854_v49 = vsel %vm822_vm12, 16843009, %v3550_v8 }
  0xf6   :  { %vm824_vm14 = vnez %v767_v43  ;;  %v885_v6 = vunpack.c.0.s8 %v853_v7  ;;  %vm2643_vm15 = vcmp.ne.s32.totalorder %v882_v34, 0  ;;  %vm2647_vm0 = vcmp.ne.s32.totalorder %v883_v44, 0 }
  0xf7   :  { %v752_v62 = vunpack.c.2.s8 %v2614_v55  ;;  %v776_v35 = vpack.c.b16 %v733_v9, %v733_v9  ;;  %v855_v24 = vsel %vm823_vm13, 16843009, %v3550_v8  ;;  %v773_v31 = vpack.c.b8 %v772_v17, %v772_v17 }
  0xf8   :  { %vm825_vm1 = vnez %v769_v54  ;;  %v886_v38 = vunpack.c.0.s8 %v854_v49  ;;  %vm2654_vm2 = vcmp.ne.s32.totalorder %v884_v63, 0  ;;  %v778_v34 = vpack.c.b16 %v734_v27, %v734_v27 }
  0xf9   :  { %v856_v44 = vsel %vm824_vm14, 16843009, %v3550_v8  ;;  %v946_v7 = vsel %vm2643_vm15, %v2325_v39, %v2515_v4  ;;  %v947_v9 = vsel %vm2647_vm0, %v2329_v1, %v2518_v61  ;;  %v775_v17 = vpack.c.b8 %v774_v45, %v774_v45 }
  0xfa   :  { %vm826_vm3 = vnez %v771_v14  ;;  %v887_v54 = vunpack.c.0.s8 %v855_v24  ;;  %vm2667_vm4 = vcmp.ne.s32.totalorder %v885_v6, 0  ;;  %v777_v27 = vpack.c.b8 %v776_v35, %v776_v35 }
  0xfb   :  { %v3569_v49 = vunpack.c.1.s8 %v2591_v50  ;;  %v857_v56 = vsel %vm825_vm1, 16843009, %v3550_v8  ;;  %v948_v39 = vsel %vm2654_vm2, %v2333_v10, %v2521_v13  ;;  %vm827_vm5 = vnez %v773_v31 }
  0xfc   :  { %v888_v61 = vunpack.c.0.s8 %v856_v44  ;;  %vm2679_vm6 = vcmp.ne.s32.totalorder %v886_v38, 0  ;;  %v978_v4 = vadd.f32 %v947_v9, %v946_v7  ;;  %v779_v45 = vpack.c.b8 %v778_v34, %v778_v34 }
  0xfd   :  { %v780_v22 = vpack.c.b16 %v3569_v49, %v3569_v49  ;;  %v3572_v14 = vunpack.c.2.s8 %v2591_v50  ;;  %v858_v41 = vsel %vm826_vm3, 16843009, %v3550_v8  ;;  %v949_v35 = vsel %vm2667_vm4, %v2337_v30, %v2524_v51 }
  0xfe   :  { %vm828_vm7 = vnez %v775_v17  ;;  %v889_v10 = vunpack.c.0.s8 %v857_v56  ;;  %vm2691_vm8 = vcmp.ne.s32.totalorder %v887_v54, 0  ;;  %v979_v24 = vadd.f32 %v978_v4, %v948_v39 }
  0xff   :  { %v782_v6 = vpack.c.b16 %v3572_v14, %v3572_v14  ;;  %v781_v31 = vpack.c.b8 %v780_v22, %v780_v22  ;;  %v3575_v38 = vunpack.c.3.s8 %v2591_v50  ;;  %v859_v34 = vsel %vm827_vm5, 16843009, %v3550_v8 }
 0x100   :  { %v950_v44 = vsel %vm2679_vm6, %v2341_v25, %v2527_v20  ;;  %vm829_vm9 = vnez %v777_v27  ;;  %v890_v30 = vunpack.c.0.s8 %v858_v41  ;;  %vm2703_vm10 = vcmp.ne.s32.totalorder %v888_v61, 0 }
 0x101   :  { %v784_v43 = vpack.c.b16 %v3575_v38, %v3575_v38  ;;  %v980_v7 = vadd.f32 %v979_v24, %v949_v35  ;;  %v783_v9 = vpack.c.b8 %v782_v6, %v782_v6  ;;  %v3578_v22 = vunpack.c.0.s8 %v2596_v32 }
 0x102   :  { %v860_v17 = vsel %vm828_vm7, 16843009, %v3550_v8  ;;  %v951_v54 = vsel %vm2691_vm8, %v2345_v15, %v2530_v52  ;;  %vm830_vm11 = vnez %v779_v45  ;;  %v891_v25 = vunpack.c.0.s8 %v859_v34 }
 0x103   :  { %v786_v50 = vpack.c.b16 %v3578_v22, %v3578_v22  ;;  %vm2715_vm12 = vcmp.ne.s32.totalorder %v889_v10, 0  ;;  %v981_v63 = vadd.f32 %v980_v7, %v950_v44  ;;  %v785_v27 = vpack.c.b8 %v784_v43, %v784_v43 }
 0x104   :  { %v3581_v49 = vunpack.c.1.s8 %v2596_v32  ;;  %v861_v39 = vsel %vm829_vm9, 16843009, %v3550_v8  ;;  %v952_v61 = vsel %vm2703_vm10, %v2350_v5, %v2533_v26  ;;  %vm831_vm13 = vnez %v781_v31 }
 0x105   :  { %v892_v15 = vunpack.c.0.s8 %v860_v17  ;;  %vm2727_vm14 = vcmp.ne.s32.totalorder %v890_v30, 0  ;;  %v982_v1 = vadd.f32 %v981_v63, %v951_v54  ;;  %v787_v4 = vpack.c.b8 %v786_v50, %v786_v50 }
 0x106   :  { %v788_v56 = vpack.c.b16 %v3581_v49, %v3581_v49  ;;  %v3584_v45 = vunpack.c.2.s8 %v2596_v32  ;;  %v862_v6 = vsel %vm830_vm11, 16843009, %v3550_v8  ;;  %v953_v41 = vsel %vm2715_vm12, %v2354_v42, %v2536_v23 }
 0x107   :  { %vm832_vm15 = vnez %v783_v9  ;;  %v893_v5 = vunpack.c.0.s8 %v861_v39  ;;  %vm2739_vm0 = vcmp.ne.s32.totalorder %v891_v25, 0  ;;  %v983_v35 = vadd.f32 %v982_v1, %v952_v61 }
 0x108   :  { %v790_v14 = vpack.c.b16 %v3584_v45, %v3584_v45  ;;  %v789_v10 = vpack.c.b8 %v788_v56, %v788_v56  ;;  %v3587_v13 = vunpack.c.3.s8 %v2596_v32  ;;  %v863_v31 = vsel %vm831_vm13, 16843009, %v3550_v8 }
 0x109   :  { %v954_v38 = vsel %vm2727_vm14, %v2358_v33, %v2539_v60  ;;  %vm833_vm1 = vnez %v785_v27  ;;  %v894_v42 = vunpack.c.0.s8 %v862_v6  ;;  %vm2751_vm2 = vcmp.ne.s32.totalorder %v892_v15, 0 }
 0x10a   :  { %v792_v24 = vpack.c.b16 %v3587_v13, %v3587_v13  ;;  %v984_v43 = vadd.f32 %v983_v35, %v953_v41  ;;  %v791_v34 = vpack.c.b8 %v790_v14, %v790_v14  ;;  %v3590_v44 = vunpack.c.0.s8 %v2604_v2 }
 0x10b   :  { %v864_v30 = vsel %vm832_vm15, 16843009, %v3550_v8  ;;  %v955_v51 = vsel %vm2739_vm0, %v2362_v47, %v2542_v0  ;;  %vm834_vm3 = vnez %v787_v4  ;;  %v895_v33 = vunpack.c.0.s8 %v863_v31 }
 0x10c   :  { %v794_v32 = vpack.c.b16 %v3590_v44, %v3590_v44  ;;  %vm2763_vm4 = vcmp.ne.s32.totalorder %v893_v5, 0  ;;  %v985_v7 = vadd.f32 %v984_v43, %v954_v38  ;;  %v793_v9 = vpack.c.b8 %v792_v24, %v792_v24 }
 0x10d   :  { %v3593_v22 = vunpack.c.1.s8 %v2604_v2  ;;  %v865_v17 = vsel %vm833_vm1, 16843009, %v3550_v8  ;;  %v956_v54 = vsel %vm2751_vm2, %v2366_v29, %v2545_v11  ;;  %vm835_vm5 = vnez %v789_v10 }
 0x10e   :  { %v896_v47 = vunpack.c.0.s8 %v864_v30  ;;  %vm2775_vm6 = vcmp.ne.s32.totalorder %v894_v42, 0  ;;  %v986_v25 = vadd.f32 %v985_v7, %v955_v51  ;;  %v795_v20 = vpack.c.b8 %v794_v32, %v794_v32  ;;  %v3644_v7 = vld [vmem:[#allocation122_spill] sm:$0xff] }
 0x10f   :  { %v796_v50 = vpack.c.b16 %v3593_v22, %v3593_v22  ;;  %v3596_v63 = vunpack.c.2.s8 %v2604_v2  ;;  %v866_v49 = vsel %vm834_vm3, 16843009, %v3550_v8  ;;  %v957_v56 = vsel %vm2763_vm4, %v2370_v59, %v2548_v48 }
 0x110   :  { %vm836_vm7 = vnez %v791_v34  ;;  %v897_v29 = vunpack.c.0.s8 %v865_v17  ;;  %vm2787_vm8 = vcmp.ne.s32.totalorder %v895_v33, 0  ;;  %v987_v39 = vadd.f32 %v986_v25, %v956_v54  ;;  %v3608_v34 = vld [vmem:[#allocation82_spill] sm:$0xff]  ;;  %v3611_v33 = vld [vmem:[#allocation83_spill] sm:$0xff] }
 0x111   :  { %v798_v27 = vpack.c.b16 %v3596_v63, %v3596_v63  ;;  %v797_v61 = vpack.c.b8 %v796_v50, %v796_v50  ;;  %v3599_v15 = vunpack.c.3.s8 %v2604_v2  ;;  %v867_v1 = vsel %vm835_vm5, 16843009, %v3550_v8  ;;  %v3614_v50 = vld [vmem:[#allocation28_spill] sm:$0xff]  ;;  %v3618_v63 = vld [vmem:[#allocation29_spill] sm:$0xff] }
 0x112   :  { %v958_v4 = vsel %vm2775_vm6, %v2374_v18, %v2551_v28  ;;  %vm837_vm9 = vnez %v793_v9  ;;  %v898_v59 = vunpack.c.0.s8 %v866_v49  ;;  %vm2799_vm10 = vcmp.ne.s32.totalorder %v896_v47, 0  ;;  %v3630_v28 = vld [vmem:[#allocation120_spill] sm:$0xff] }
 0x113   :  { %v800_v52 = vpack.c.b16 %v3599_v15, %v3599_v15  ;;  %v988_v45 = vadd.f32 %v987_v39, %v957_v56  ;;  %v799_v14 = vpack.c.b8 %v798_v27, %v798_v27  ;;  %v3602_v6 = vunpack.c.0.s8 %v2609_v36  ;;  %v3621_v39 = vld [vmem:[#allocation60_spill] sm:$0xff] }
 0x114   :  { %v868_v41 = vsel %vm836_vm7, 16843009, %v3550_v8  ;;  %v959_v5 = vsel %vm2787_vm8, %v2378_v19, %v2554_v16  ;;  %vm838_vm11 = vnez %v795_v20  ;;  %v899_v18 = vunpack.c.0.s8 %v867_v1  ;;  %v3617_v20 = vld [vmem:[#allocation55_spill] sm:$0xff] }
 0x115   :  { %v802_v2 = vpack.c.b16 %v3602_v6, %v3602_v6  ;;  %vm2811_vm12 = vcmp.ne.s32.totalorder %v897_v29, 0  ;;  %v989_v26 = vadd.f32 %v988_v45, %v958_v4  ;;  %v801_v35 = vpack.c.b8 %v800_v52, %v800_v52  ;;  %v3627_v6 = vld [vmem:[#allocation33_spill] sm:$0xff] }
 0x116   :  { %v3605_v10 = vunpack.c.1.s8 %v2609_v36  ;;  %v869_v24 = vsel %vm837_vm9, 16843009, %v3550_v8  ;;  %v960_v31 = vsel %vm2799_vm10, %v2382_v58, %v2557_v46  ;;  %vm839_vm13 = vnez %v797_v61  ;;  %v3622_v61 = vld [vmem:[#allocation32_spill] sm:$0xff] }
 0x117   :  { %v900_v19 = vunpack.c.0.s8 %v868_v41  ;;  %vm2823_vm14 = vcmp.ne.s32.totalorder %v898_v59, 0  ;;  %v990_v38 = vadd.f32 %v989_v26, %v959_v5  ;;  %v803_v42 = vpack.c.b8 %v802_v2, %v802_v2  ;;  %v3631_v26 = vld [vmem:[#allocation48_spill] sm:$0xff]  ;;  %v1197_v5 = vld [vmem:[#allocation2 + $0xf0] sm:$0xff] }
 0x118   :  { %v804_v13 = vpack.c.b16 %v3605_v10, %v3605_v10  ;;  %v806_v23 = vpack.c.b16 %v748_v57, %v748_v57  ;;  %v870_v43 = vsel %vm838_vm11, 16843009, %v3550_v8  ;;  %v961_v44 = vsel %vm2811_vm12, %v3608_v34, %v2560_v37  ;;  %v3639_v46 = vld [vmem:[#allocation36_spill] sm:$0xff] }
 0x119   :  { %vm840_vm15 = vnez %v799_v14  ;;  %v901_v58 = vunpack.c.0.s8 %v869_v24  ;;  %vm2835_vm0 = vcmp.ne.s32.totalorder %v899_v18, 0  ;;  %v991_v32 = vadd.f32 %v990_v38, %v960_v31  ;;  %v3626_v14 = vld [vmem:[#allocation61_spill] sm:$0xff]  ;;  %v3633_v24 = vld [vmem:[#allocation35_spill] sm:$0xff] }
 0x11a   :  { %v805_v30 = vpack.c.b8 %v804_v13, %v804_v13  ;;  %v808_v51 = vpack.c.b16 %v749_v3, %v749_v3  ;;  %v871_v57 = vsel %vm839_vm13, 16843009, %v3550_v8  ;;  %v962_v60 = vsel %vm2823_vm14, %v3611_v33, %v2563_v12  ;;  %v3632_v13 = vld [vmem:[#allocation63_spill] sm:$0xff] }
 0x11b   :  { %vm841_vm1 = vnez %v801_v35  ;;  %v902_v37 = vunpack.c.0.s8 %v870_v43  ;;  %vm2847_vm2 = vcmp.ne.s32.totalorder %v900_v19, 0  ;;  %v992_v9 = vadd.f32 %v991_v32, %v961_v44 }
 0x11c   :  { %v807_v22 = vpack.c.b8 %v806_v23, %v806_v23  ;;  %v810_v36 = vpack.c.b16 %v750_v53, %v750_v53  ;;  %v872_v3 = vsel %vm840_vm15, 16843009, %v3550_v8  ;;  %v963_v17 = vsel %vm2835_vm0, %v3614_v50, %v2566_v21  ;;  %v3637_v23 = vld [vmem:[#allocation50_spill] sm:$0xff] }
 0x11d   :  { %vm842_vm3 = vnez %v803_v42  ;;  %v903_v12 = vunpack.c.0.s8 %v871_v57  ;;  %vm2859_vm4 = vcmp.ne.s32.totalorder %v901_v58, 0  ;;  %v993_v47 = vadd.f32 %v992_v9, %v962_v60  ;;  %v3636_v42 = vld [vmem:[#allocation121_spill] sm:$0xff]  ;;  %v1194_v60 = vld [vmem:[#allocation2 + $0xd8] sm:$0xff] }
 0x11e   :  { %v809_v0 = vpack.c.b8 %v808_v51, %v808_v51  ;;  %v812_v25 = vpack.c.b16 %v751_v40, %v751_v40  ;;  %v873_v53 = vsel %vm841_vm1, 16843009, %v3550_v8  ;;  %v964_v27 = vsel %vm2847_vm2, %v3618_v63, %v3617_v20  ;;  %v3638_v58 = vld [vmem:[#allocation65_spill] sm:$0xff]  ;;  %v3645_v9 = vld [vmem:[#allocation51_spill] sm:$0xff]  ;;  %v3652_v20 = vld [vmem:[#allocation54_spill] sm:$0xff] }
 0x11f   :  { %vm843_vm5 = vnez %v805_v30  ;;  %v904_v21 = vunpack.c.0.s8 %v872_v3  ;;  %vm2871_vm6 = vcmp.ne.s32.totalorder %v902_v37, 0  ;;  %v994_v56 = vadd.f32 %v993_v47, %v963_v17  ;;  %v3646_v3 = vld [vmem:[#allocation38_spill] sm:$0xff]  ;;  %v3675_v57 = vld [vmem:[#allocation25_spill] sm:$0xff] }
 0x120   :  { %v811_v29 = vpack.c.b8 %v810_v36, %v810_v36  ;;  %v814_v11 = vpack.c.b16 %v752_v62, %v752_v62  ;;  %v874_v40 = vsel %vm842_vm3, 16843009, %v3550_v8  ;;  %v965_v15 = vsel %vm2859_vm4, %v3622_v61, %v3621_v39  ;;  %v1196_v39 = vld [vmem:[#allocation2 + $0xe8] sm:$0xff] }
 0x121   :  { %vm844_vm7 = vnez %v807_v22  ;;  %v905_v52 = vunpack.c.0.s8 %v873_v53  ;;  %vm2883_vm8 = vcmp.ne.s32.totalorder %v903_v12, 0  ;;  %v995_v4 = vadd.f32 %v994_v56, %v964_v27  ;;  %v3651_v53 = vld [vmem:[#allocation123_spill] sm:$0xff] }
 0x122   :  { %v813_v59 = vpack.c.b8 %v812_v25, %v812_v25  ;;  %v3625_v48 = vunpack.c.3.s8 %v2614_v55  ;;  %v875_v62 = vsel %vm843_vm5, 16843009, %v3550_v8  ;;  %v966_v2 = vsel %vm2871_vm6, %v3627_v6, %v3626_v14 }
 0x123   :  { %vm845_vm9 = vnez %v809_v0  ;;  %v906_v41 = vunpack.c.0.s8 %v874_v40  ;;  %vm2895_vm10 = vcmp.ne.s32.totalorder %v904_v21, 0  ;;  %v996_v18 = vadd.f32 %v995_v4, %v965_v15  ;;  %v1195_v0 = vld [vmem:[#allocation2 + $0xe0] sm:$0xff]  ;;  %v3653_v21 = vld [vmem:[#allocation41_spill] sm:$0xff]  ;;  %v3659_v4 = vld [vmem:[#allocation42_spill] sm:$0xff] }
 0x124   :  { %v816_v45 = vpack.c.b16 %v3625_v48, %v3625_v48  ;;  %v705_v35 = vmul.f32 %v3631_v26, %v3630_v28  ;;  %v815_v55 = vpack.c.b8 %v814_v11, %v814_v11  ;;  %v876_v10 = vsel %vm844_vm7, 16843009, %v3550_v8  ;;  %v3658_v15 = vld [vmem:[#allocation124_spill] sm:$0xff]  ;;  %v3665_v28 = vld [vmem:[#allocation125_spill] sm:$0xff] }
 0x125   :  { %v967_v31 = vsel %vm2883_vm8, %v3633_v24, %v3632_v13  ;;  %vm846_vm11 = vnez %v811_v29  ;;  %v907_v19 = vunpack.c.0.s8 %v875_v62  ;;  %vm2906_vm12 = vcmp.ne.s32.totalorder %v905_v52, 0  ;;  %v3660_v48 = vld [vmem:[#allocation116_spill] sm:$0xff]  ;;  %v3662_v62 = vld [vmem:[#allocation77_spill] sm:$0xff] }
 0x126   :  { %v997_v38 = vadd.f32 %v996_v18, %v966_v2  ;;  %v706_v43 = vmul.f32 %v3637_v23, %v3636_v42  ;;  %v817_v34 = vpack.c.b8 %v816_v45, %v816_v45  ;;  %v877_v44 = vsel %vm845_vm9, 16843009, %v3550_v8  ;;  %v3667_v13 = vld [vmem:[#allocation76_spill] sm:$0xff]  ;;  %v3672_v23 = vld [vmem:[#allocation79_spill] sm:$0xff] }
 0x127   :  { %v968_v32 = vsel %vm2895_vm10, %v3639_v46, %v3638_v58  ;;  %vm2917_vm13 = vnez %v813_v59  ;;  %v908_v51 = vunpack.c.0.s8 %v876_v10  ;;  %vm2921_vm14 = vcmp.ne.s32.totalorder %v906_v41, 0  ;;  %v3674_v46 = vld [vmem:[#allocation47_spill] sm:$0xff] }
 0x128   :  { %v998_v33 = vadd.f32 %v997_v38, %v967_v31  ;;  %v677_v37 = vmul.f32 %v1194_v60, %v1194_v60  ;;  %v707_v22 = vmul.f32 %v3645_v9, %v3644_v7  ;;  %v878_v36 = vsel %vm846_vm11, 16843009, %v3550_v8  ;;  %v3670_v38 = vld [vmem:[#allocation24_spill] sm:$0xff]  ;;  %v3678_v7 = vld [vmem:[#allocation127_spill] sm:$0xff] }
 0x129   :  { %v969_v50 = vsel %vm2906_vm12, %v3646_v3, %v705_v35  ;;  %vm2931_vm15 = vnez %v815_v55  ;;  %v909_v12 = vunpack.c.0.s8 %v877_v44  ;;  %vm2935_vm0 = vcmp.ne.s32.totalorder %v907_v19, 0  ;;  %v3666_v55 = vld [vmem:[#allocation44_spill] sm:$0xff]  ;;  %v3679_v3 = vld [vmem:[#allocation26_spill] sm:$0xff] }
 0x12a   :  { %v999_v47 = vadd.f32 %v998_v33, %v968_v32  ;;  %v678_v25 = vmul.f32 %v1195_v0, %v1195_v0  ;;  %v708_v63 = vmul.f32 %v3652_v20, %v3651_v53  ;;  %v879_v27 = vsel %vm2917_vm13, 16843009, %v3550_v8  ;;  %v3677_v60 = vld [vmem:[#allocation80_spill] sm:$0xff] }
 0x12b   :  { %v970_v49 = vsel %vm2921_vm14, %v3653_v21, %v706_v43  ;;  %vm2947_vm1 = vnez %v817_v34  ;;  %v910_v29 = vunpack.c.0.s8 %v878_v36  ;;  %vm2951_vm2 = vcmp.ne.s32.totalorder %v908_v51, 0  ;;  %v1198_v34 = vld [vmem:[#allocation2 + $0xf8] sm:$0xff] }
 0x12c   :  { %v1000_v40 = vadd.f32 %v999_v47, %v969_v50  ;;  %v679_v61 = vmul.f32 %v1196_v39, %v1196_v39  ;;  %v709_v52 = vmul.f32 %v677_v37, %v3658_v15  ;;  %v880_v1 = vsel %vm2931_vm15, 16843009, %v3550_v8 }
 0x12d   :  { %v971_v59 = vsel %vm2935_vm0, %v3659_v4, %v707_v22  ;;  %v3661_v45 = vsub.f32 0.0, %v3660_v48  ;;  %v911_v6 = vunpack.c.0.s8 %v879_v27  ;;  %vm2965_vm3 = vcmp.ne.s32.totalorder %v909_v12, 0  ;;  %v3681_v12 = vld [vmem:[#allocation128_spill] sm:$0xff] }
 0x12e   :  { %v1001_v41 = vadd.f32 %v1000_v40, %v970_v49  ;;  %v680_v18 = vmul.f32 %v1197_v5, %v1197_v5  ;;  %v710_v26 = vmul.f32 %v678_v25, %v3665_v28  ;;  %v881_v35 = vsel %vm2947_vm1, 16843009, %v3550_v8  ;;  %v3673_v8 = vld [vmem:[#allocation126_spill] sm:$0xff] }
 0x12f   :  { %v646_v14 = vmul.f32 %v3662_v62, %v3661_v45  ;;  %v972_v10 = vsel %vm2951_vm2, %v3666_v55, %v708_v63  ;;  %v617_v24 = vmul.f32 %v3667_v13, %v3667_v13  ;;  %v912_v31 = vunpack.c.0.s8 %v880_v1 }
 0x130   :  { %vm2978_vm4 = vcmp.ne.s32.totalorder %v910_v29, 0  ;;  %v1002_v16 = vadd.f32 %v1001_v41, %v971_v59  ;;  %v3671_v42 = vsub.f32 0.0, %v3670_v38  ;;  %v681_v44 = vmul.f32 %v1198_v34, %v1198_v34 }
 0x131   :  { %v711_v58 = vmul.f32 %v679_v61, %v3673_v8  ;;  %v973_v32 = vsel %vm2965_vm3, %v3674_v46, %v709_v52  ;;  %v913_v30 = vunpack.c.0.s8 %v881_v35  ;;  %vm943_vm5 = vcmp.ne.s32.totalorder %v911_v6, 0 }
 0x132   :  { %v647_v43 = vmul.f32 %v3672_v23, %v3671_v42  ;;  %v1003_v51 = vadd.f32 %v1002_v16, %v972_v10  ;;  %v3676_v33 = vsub.f32 0.0, %v3675_v57  ;;  %v712_v9 = vmul.f32 %v680_v18, %v3678_v7 }
 0x133   :  { %v974_v22 = vsel %vm2978_vm4, %v646_v14, %v710_v26  ;;  %vm944_vm6 = vcmp.ne.s32.totalorder %v912_v31, 0  ;;  %v3680_v50 = vsub.f32 0.0, %v3679_v3  ;;  %v713_v54 = vmul.f32 %v681_v44, %v3681_v12 }
 0x134   :  { %v648_v37 = vmul.f32 %v3677_v60, %v3676_v33  ;;  %v1004_v36 = vadd.f32 %v1003_v51, %v973_v32  ;;  %v975_v47 = vsel %vm943_vm5, %v647_v43, %v711_v58  ;;  %vm945_vm7 = vcmp.ne.s32.totalorder %v913_v30, 0 }
 0x135   :  { %v649_v17 = vmul.f32 %v617_v24, %v3680_v50 }
 0x136   :  { %v1005_v0 = vadd.f32 %v1004_v36, %v974_v22  ;;  %v976_v25 = vsel %vm944_vm6, %v648_v37, %v712_v9 }
 0x137   :  { %v977_v20 = vsel %vm945_vm7, %v649_v17, %v713_v54 }
 0x138   :  { %v1006_v53 = vadd.f32 %v1005_v0, %v975_v47 }
 0x13a   :  { %v1007_v63 = vadd.f32 %v1006_v53, %v976_v25 }
 0x13c   :  { %v1008_v27 = vadd.f32 %v1007_v63, %v977_v20 }
 0x13e   :  { %v1009_v21 = vrot.slane %v1008_v27, 4 }
 0x140   :  { %v1010_v49 = vadd.f32 %v1009_v21, %v1008_v27 }
 0x142   :  { %v1011_v56 = vrot.slane %v1010_v49, 2 }
 0x144   :  { %v1012_v29 = vadd.f32 %v1011_v56, %v1010_v49 }
 0x146   :  { %v1013_v11 = vrot.slane %v1012_v29, 1 }
 0x148   :  { %v1014_v40 = vadd.f32 %v1013_v11, %v1012_v29 }
 0x14a   :  { %1015 = vst [vmem:[#allocation8] sm:$0x1] %v1014_v40 }
 0x14b   :  { %1276 = shalt.err (!%p1273_p0)
}
 0x14c   :  { %s1277_s26 = scalar_lea.hbm %s3013_s3, 16 }
 0x14d   :  { %p1278_p1 = scmp.ne.s32.totalorder %s3013_s3, %s1277_s26  ;;  %p1281_p2 = scmp.lt.u32.totalorder %s1277_s26, %s3013_s3 }
 0x14f   :  { %p1283_p3 = pnand %p1281_p2, %p1278_p1 }
 0x151   :  { %1286 = shalt.err (!%p1283_p3)
}
 0x152   :  { %1025 = dma.vmem_to_hbm [thread:$0]  %s1023_s21, 16, %s3013_s3, [#allocation4]  }
 0x153   :  { %1291 = dma.done.wait [#allocation4], 16  }
 0x154   :  { %1292 = vsyncadd [#allocation4], 4294967280 }
 0x155   :  { %1029 = vsyncpa [#allocation3], 1 }
 0x156   :  { %1030 = vsyncpa [#allocation6], 1 }
 0x157   :  { %1031 = vsyncpa [#allocation4], 1 }

</bundles_post_ra>
